<compile_context>
chip_gen: v7x
topology: tpu7x:2x2x1
jax: 0.10.0
libtpu: 0.0.40
codegen_flags: <defaults>
</compile_context>

<pallas_src>
import functools

import jax
import jax.numpy as jnp
from jax.experimental import pallas as pl
from jax.experimental.pallas import tpu as pltpu

# ---------------- configuration ----------------
VOCAB_SIZE = 100
VOCAB_PAD = 128      # pad vocab so the one-hot gather matmul has an aligned K dim
MAX_POS = 16
HIDDEN = 32          # bert.config.hidden_size (real DistilBERT: 768)
N_HEADS = 4          # real: 12
HEAD_DIM = HIDDEN // N_HEADS
N_LAYERS = 2         # real: 6
FFN_DIM = 4 * HIDDEN # real: 3072
NUM_CLASSES = 4
CLS_PAD = 128        # lane-dense (128-wide) logits slab; sliced to NUM_CLASSES in the wrapper
LN_EPS = 1e-12       # DistilBERT LayerNorm eps


# ---------------- in-kernel helpers (all f32 elementwise math) ----------------
def _layernorm(x, g, b):
    mu = jnp.mean(x, axis=-1, keepdims=True)
    var = jnp.mean((x - mu) ** 2, axis=-1, keepdims=True)
    return (x - mu) * jax.lax.rsqrt(var + LN_EPS) * g + b


def _gelu(x):
    # TODO(synk): HF DistilBERT uses the exact erf-based GELU; tanh approximation used here
    # (erf lowering in Mosaic is not guaranteed), ~1e-3-level divergence.
    return 0.5 * x * (1.0 + jnp.tanh(0.7978845608028654 * (x + 0.044715 * x * x * x)))


# ---------------- the fused whole-model kernel (one batch element per grid step) ----------
def _distilbert_kernel(ids_ref, mask_ref,
                       wemb_ref, pemb_ref, eg_ref, eb_ref,
                       qkvw_ref, qkvb_ref, ow_ref, ob_ref, g1_ref, b1_ref,
                       f1w_ref, f1b_ref, f2w_ref, f2b_ref, g2_ref, b2_ref,
                       c1w_ref, c1b_ref, c2w_ref, c2b_ref,
                       logits_ref, *, seq):
    f32, bf16 = jnp.float32, jnp.bfloat16
    S, H, nH, dh = seq, HIDDEN, N_HEADS, HEAD_DIM
    neg_inf = jnp.finfo(f32).min

    # ---- embeddings: one-hot gather on the MXU (bf16 operands, f32 acc) + pos add + LN ----
    ids = ids_ref[...].reshape(S, 1)                                      # int32
    vocab_iota = jax.lax.broadcasted_iota(jnp.int32, (S, VOCAB_PAD), 1)
    onehot = (vocab_iota == ids).astype(bf16)                             # [S, VOCAB_PAD]
    x = jnp.dot(onehot, wemb_ref[...], preferred_element_type=f32)        # [S, H] f32
    x = x + pemb_ref[...]
    x = _layernorm(x, eg_ref[...], eb_ref[...])

    keep = mask_ref[...] > 0.5                                            # [1, 1, S]

    # ---- encoder layers (statically unrolled; activations stay VMEM/vreg-resident) ----
    for l in range(N_LAYERS):
        xb = x.astype(bf16)
        # Q/K/V as three separate matmuls (no sub-128-lane slicing of a fused qkv tensor).
        # 1/sqrt(head_dim) is folded into the Q weights/bias at pack time.
        q = jnp.dot(xb, qkvw_ref[l, 0], preferred_element_type=f32) + qkvb_ref[l, 0]
        k = jnp.dot(xb, qkvw_ref[l, 1], preferred_element_type=f32) + qkvb_ref[l, 1]
        v = jnp.dot(xb, qkvw_ref[l, 2], preferred_element_type=f32) + qkvb_ref[l, 2]

        # Batched-head attention: one QK^T einsum, one PV einsum, one o-projection matmul.
        q4 = q.astype(bf16).reshape(S, nH, dh).swapaxes(0, 1)             # [nH, S, dh]
        k4 = k.astype(bf16).reshape(S, nH, dh).swapaxes(0, 1)
        v4 = v.astype(bf16).reshape(S, nH, dh).swapaxes(0, 1)

        s = jnp.einsum("hqd,hkd->hqk", q4, k4, preferred_element_type=f32)  # [nH, S, S]
        s = jnp.where(keep, s, neg_inf)
        m = jnp.max(s, axis=-1, keepdims=True)
        p = jnp.exp(s - m)
        p = p * pl.reciprocal(jnp.sum(p, axis=-1, keepdims=True), approx=True)

        ctx = jnp.einsum("hqk,hkd->hqd", p.astype(bf16), v4,
                         preferred_element_type=f32)                       # [nH, S, dh]
        ctx = ctx.swapaxes(0, 1).reshape(S, H).astype(bf16)                # merge heads
        sa = jnp.dot(ctx, ow_ref[l], preferred_element_type=f32) + ob_ref[l]

        x = _layernorm(sa + x, g1_ref[l], b1_ref[l])                       # post-LN residual

        # fused FFN: Linear -> GELU -> Linear (intermediate never leaves VMEM)
        hdn = _gelu(jnp.dot(x.astype(bf16), f1w_ref[l],
                            preferred_element_type=f32) + f1b_ref[l])
        ffn = jnp.dot(hdn.astype(bf16), f2w_ref[l],
                      preferred_element_type=f32) + f2b_ref[l]
        x = _layernorm(ffn + x, g2_ref[l], b2_ref[l])

    # ---- CLS-token classifier head: Linear -> ReLU -> Linear (lane-padded output) ----
    cls = x[0:1, :].astype(bf16)                                           # [1, H]
    h1 = jnp.maximum(
        jnp.dot(cls, c1w_ref[...], preferred_element_type=f32) + c1b_ref[...], 0.0)
    logits = jnp.dot(h1.astype(bf16), c2w_ref[...],
                     preferred_element_type=f32) + c2b_ref[...]            # [1, CLS_PAD]
    logits_ref[...] = logits.reshape(1, 1, CLS_PAD)


# ---------------- parameters ----------------
def init_params(key):
    def nrm(k, shape):
        return 0.02 * jax.random.normal(k, shape, jnp.float32)

    keys = iter(jax.random.split(key, 8 + 8 * N_LAYERS))
    p = {
        "word_emb": nrm(next(keys), (VOCAB_SIZE, HIDDEN)),
        "pos_emb": nrm(next(keys), (MAX_POS, HIDDEN)),
        "emb_ln_g": jnp.ones((HIDDEN,), jnp.float32),
        "emb_ln_b": jnp.zeros((HIDDEN,), jnp.float32),
        "c1_w": nrm(next(keys), (HIDDEN, HIDDEN)),
        "c1_b": jnp.zeros((HIDDEN,), jnp.float32),
        "c2_w": nrm(next(keys), (HIDDEN, NUM_CLASSES)),
        "c2_b": jnp.zeros((NUM_CLASSES,), jnp.float32),
        "layers": [],
    }
    for _ in range(N_LAYERS):
        lyr = {
            "q_w": nrm(next(keys), (HIDDEN, HIDDEN)), "q_b": jnp.zeros((HIDDEN,), jnp.float32),
            "k_w": nrm(next(keys), (HIDDEN, HIDDEN)), "k_b": jnp.zeros((HIDDEN,), jnp.float32),
            "v_w": nrm(next(keys), (HIDDEN, HIDDEN)), "v_b": jnp.zeros((HIDDEN,), jnp.float32),
            "o_w": nrm(next(keys), (HIDDEN, HIDDEN)), "o_b": jnp.zeros((HIDDEN,), jnp.float32),
            "sa_ln_g": jnp.ones((HIDDEN,), jnp.float32), "sa_ln_b": jnp.zeros((HIDDEN,), jnp.float32),
            "ffn1_w": nrm(next(keys), (HIDDEN, FFN_DIM)), "ffn1_b": jnp.zeros((FFN_DIM,), jnp.float32),
            "ffn2_w": nrm(next(keys), (FFN_DIM, HIDDEN)), "ffn2_b": jnp.zeros((HIDDEN,), jnp.float32),
            "out_ln_g": jnp.ones((HIDDEN,), jnp.float32), "out_ln_b": jnp.zeros((HIDDEN,), jnp.float32),
        }
        p["layers"].append(lyr)
    return p


def pack_params(p):
    """One-time repacking for the fused kernel: per-layer stacking, attention scale folded into
    Q, vocab/class padding, and bf16 casts for every matmul weight (biases & LN params stay f32)."""
    scale = 1.0 / (HEAD_DIM ** 0.5)
    bf16 = jnp.bfloat16

    def stack(fn):
        return jnp.stack([fn(lyr) for lyr in p["layers"]])

    word_emb = jnp.zeros((VOCAB_PAD, HIDDEN), jnp.float32).at[:VOCAB_SIZE].set(p["word_emb"])
    c2_w = jnp.zeros((HIDDEN, CLS_PAD), jnp.float32).at[:, :NUM_CLASSES].set(p["c2_w"])
    c2_b = jnp.zeros((1, CLS_PAD), jnp.float32).at[0, :NUM_CLASSES].set(p["c2_b"])
    return {
        "word_emb": word_emb.astype(bf16),
        "pos_emb": p["pos_emb"],
        "emb_ln_g": p["emb_ln_g"].reshape(1, HIDDEN),
        "emb_ln_b": p["emb_ln_b"].reshape(1, HIDDEN),
        "qkv_w": stack(lambda l: jnp.stack(
            [l["q_w"] * scale, l["k_w"], l["v_w"]])).astype(bf16),               # [L, 3, H, H]
        "qkv_b": stack(lambda l: jnp.stack(
            [l["q_b"] * scale, l["k_b"], l["v_b"]]).reshape(3, 1, HIDDEN)),       # [L, 3, 1, H]
        "o_w": stack(lambda l: l["o_w"]).astype(bf16),                            # [L, H, H]
        "o_b": stack(lambda l: l["o_b"].reshape(1, HIDDEN)),
        "sa_ln_g": stack(lambda l: l["sa_ln_g"].reshape(1, HIDDEN)),
        "sa_ln_b": stack(lambda l: l["sa_ln_b"].reshape(1, HIDDEN)),
        "ffn1_w": stack(lambda l: l["ffn1_w"]).astype(bf16),                      # [L, H, F]
        "ffn1_b": stack(lambda l: l["ffn1_b"].reshape(1, FFN_DIM)),
        "ffn2_w": stack(lambda l: l["ffn2_w"]).astype(bf16),                      # [L, F, H]
        "ffn2_b": stack(lambda l: l["ffn2_b"].reshape(1, HIDDEN)),
        "out_ln_g": stack(lambda l: l["out_ln_g"].reshape(1, HIDDEN)),
        "out_ln_b": stack(lambda l: l["out_ln_b"].reshape(1, HIDDEN)),
        "c1_w": p["c1_w"].astype(bf16),
        "c1_b": p["c1_b"].reshape(1, HIDDEN),
        "c2_w": c2_w.astype(bf16),
        "c2_b": c2_b,
    }


def _const_spec(arr):
    """Full-array block with a constant index map: DMA'd once, VMEM-resident across the grid."""
    nd = arr.ndim
    return pl.BlockSpec(arr.shape, lambda b, _nd=nd: (0,) * _nd)


# ---------------- forward pass: one pallas_call, batch-parallel grid ----------------
@jax.jit
def distilbert_class_forward(packed, input_ids, attention_mask):
    B, S = input_ids.shape
    ids = input_ids.reshape(B, S, 1).astype(jnp.int32)
    mask = attention_mask.astype(jnp.float32).reshape(B, 1, S)

    operands = (
        ids, mask,
        packed["word_emb"], packed["pos_emb"][:S],
        packed["emb_ln_g"], packed["emb_ln_b"],
        packed["qkv_w"], packed["qkv_b"],
        packed["o_w"], packed["o_b"],
        packed["sa_ln_g"], packed["sa_ln_b"],
        packed["ffn1_w"], packed["ffn1_b"],
        packed["ffn2_w"], packed["ffn2_b"],
        packed["out_ln_g"], packed["out_ln_b"],
        packed["c1_w"], packed["c1_b"],
        packed["c2_w"], packed["c2_b"],
    )
    in_specs = [
        pl.BlockSpec((1, S, 1), lambda b: (b, 0, 0)),   # ids  [B, S, 1]
        pl.BlockSpec((1, 1, S), lambda b: (b, 0, 0)),   # mask [B, 1, S]
    ] + [_const_spec(op) for op in operands[2:]]

    logits_pad = pl.pallas_call(
        functools.partial(_distilbert_kernel, seq=S),
        out_shape=jax.ShapeDtypeStruct((B, 1, CLS_PAD), jnp.float32),
        grid=(B,),
        in_specs=in_specs,
        out_specs=pl.BlockSpec((1, 1, CLS_PAD), lambda b: (b, 0, 0)),
        compiler_params=pltpu.CompilerParams(
            dimension_semantics=("parallel",),          # 2 TCs on v7x; no-op on v5e/v6e
            vmem_limit_bytes=32 * 1024 * 1024),
    )(*operands)
    return logits_pad[:, 0, :NUM_CLASSES]


if __name__ == "__main__":
    key = jax.random.PRNGKey(0)
    pkey, ikey = jax.random.split(key)
    params = init_params(pkey)
    packed = pack_params(params)

    B, S = 2, 8
    input_ids = jax.random.randint(ikey, (B, S), 0, VOCAB_SIZE, dtype=jnp.int32)
    attention_mask = jnp.ones((B, S), dtype=jnp.int32).at[1, 6:].set(0)  # pad tail of row 1

    logits = distilbert_class_forward(packed, input_ids, attention_mask)
    jax.block_until_ready(logits)
    assert logits.shape == (B, NUM_CLASSES) and logits.dtype == jnp.float32
    assert bool(jnp.all(jnp.isfinite(logits)))
    print("KERNEL_OK")
</pallas_src>

<mosaic_0001>
module attributes {stable_mosaic.version = 11 : i64} {
  func.func @_distilbert_kernel(%arg0: i32, %arg1: memref<1x8x1xi32, #tpu.memory_space<vmem>>, %arg2: memref<1x1x8xf32, #tpu.memory_space<vmem>>, %arg3: memref<128x32xbf16, #tpu.memory_space<vmem>>, %arg4: memref<8x32xf32, #tpu.memory_space<vmem>>, %arg5: memref<1x32xf32, #tpu.memory_space<vmem>>, %arg6: memref<1x32xf32, #tpu.memory_space<vmem>>, %arg7: memref<2x3x32x32xbf16, #tpu.memory_space<vmem>>, %arg8: memref<2x3x1x32xf32, #tpu.memory_space<vmem>>, %arg9: memref<2x32x32xbf16, #tpu.memory_space<vmem>>, %arg10: memref<2x1x32xf32, #tpu.memory_space<vmem>>, %arg11: memref<2x1x32xf32, #tpu.memory_space<vmem>>, %arg12: memref<2x1x32xf32, #tpu.memory_space<vmem>>, %arg13: memref<2x32x128xbf16, #tpu.memory_space<vmem>>, %arg14: memref<2x1x128xf32, #tpu.memory_space<vmem>>, %arg15: memref<2x128x32xbf16, #tpu.memory_space<vmem>>, %arg16: memref<2x1x32xf32, #tpu.memory_space<vmem>>, %arg17: memref<2x1x32xf32, #tpu.memory_space<vmem>>, %arg18: memref<2x1x32xf32, #tpu.memory_space<vmem>>, %arg19: memref<32x32xbf16, #tpu.memory_space<vmem>>, %arg20: memref<1x32xf32, #tpu.memory_space<vmem>>, %arg21: memref<32x128xbf16, #tpu.memory_space<vmem>>, %arg22: memref<1x128xf32, #tpu.memory_space<vmem>>, %arg23: memref<1x1x128xf32, #tpu.memory_space<vmem>>) attributes {dimension_semantics = [#tpu.dimension_semantics<parallel>], iteration_bounds = array<i64: 2>, scalar_prefetch = 0 : i64, scratch_operands = 0 : i64, tpu.core_type = #tpu.core_type<tc>, window_params = [{transform_indices = @transform_0, window_bounds = array<i64: 1, 8, 1>}, {transform_indices = @transform_1, window_bounds = array<i64: 1, 1, 8>}, {pipeline_mode = #tpu.pipeline_mode<synchronous>, transform_indices = @transform_2, window_bounds = array<i64: 128, 32>}, {pipeline_mode = #tpu.pipeline_mode<synchronous>, transform_indices = @transform_3, window_bounds = array<i64: 8, 32>}, {pipeline_mode = #tpu.pipeline_mode<synchronous>, transform_indices = @transform_4, window_bounds = array<i64: 1, 32>}, {pipeline_mode = #tpu.pipeline_mode<synchronous>, transform_indices = @transform_5, window_bounds = array<i64: 1, 32>}, {pipeline_mode = #tpu.pipeline_mode<synchronous>, transform_indices = @transform_6, window_bounds = array<i64: 2, 3, 32, 32>}, {pipeline_mode = #tpu.pipeline_mode<synchronous>, transform_indices = @transform_7, window_bounds = array<i64: 2, 3, 1, 32>}, {pipeline_mode = #tpu.pipeline_mode<synchronous>, transform_indices = @transform_8, window_bounds = array<i64: 2, 32, 32>}, {pipeline_mode = #tpu.pipeline_mode<synchronous>, transform_indices = @transform_9, window_bounds = array<i64: 2, 1, 32>}, {pipeline_mode = #tpu.pipeline_mode<synchronous>, transform_indices = @transform_10, window_bounds = array<i64: 2, 1, 32>}, {pipeline_mode = #tpu.pipeline_mode<synchronous>, transform_indices = @transform_11, window_bounds = array<i64: 2, 1, 32>}, {pipeline_mode = #tpu.pipeline_mode<synchronous>, transform_indices = @transform_12, window_bounds = array<i64: 2, 32, 128>}, {pipeline_mode = #tpu.pipeline_mode<synchronous>, transform_indices = @transform_13, window_bounds = array<i64: 2, 1, 128>}, {pipeline_mode = #tpu.pipeline_mode<synchronous>, transform_indices = @transform_14, window_bounds = array<i64: 2, 128, 32>}, {pipeline_mode = #tpu.pipeline_mode<synchronous>, transform_indices = @transform_15, window_bounds = array<i64: 2, 1, 32>}, {pipeline_mode = #tpu.pipeline_mode<synchronous>, transform_indices = @transform_16, window_bounds = array<i64: 2, 1, 32>}, {pipeline_mode = #tpu.pipeline_mode<synchronous>, transform_indices = @transform_17, window_bounds = array<i64: 2, 1, 32>}, {pipeline_mode = #tpu.pipeline_mode<synchronous>, transform_indices = @transform_18, window_bounds = array<i64: 32, 32>}, {pipeline_mode = #tpu.pipeline_mode<synchronous>, transform_indices = @transform_19, window_bounds = array<i64: 1, 32>}, {pipeline_mode = #tpu.pipeline_mode<synchronous>, transform_indices = @transform_20, window_bounds = array<i64: 32, 128>}, {pipeline_mode = #tpu.pipeline_mode<synchronous>, transform_indices = @transform_21, window_bounds = array<i64: 1, 128>}, {transform_indices = @transform_22, window_bounds = array<i64: 1, 1, 128>}]} {
    %c0 = arith.constant 0 : index
    %c0_0 = arith.constant 0 : index
    %c0_1 = arith.constant 0 : index
    %0 = vector.load %arg1[%c0, %c0_0, %c0_1] : memref<1x8x1xi32, #tpu.memory_space<vmem>>, vector<1x8x1xi32>
    %1 = vector.shape_cast %0 : vector<1x8x1xi32> to vector<8x1xi32>
    %2 = tpu.iota {dimensions = array<i32: 1>} : vector<8x128xi32>
    %3 = vector.broadcast %1 : vector<8x1xi32> to vector<8x128xi32>
    %4 = arith.cmpi eq, %2, %3 : vector<8x128xi32>
    %5 = arith.extui %4 : vector<8x128xi1> to vector<8x128xi32>
    %6 = arith.sitofp %5 : vector<8x128xi32> to vector<8x128xf32>
    %7 = arith.truncf %6 : vector<8x128xf32> to vector<8x128xbf16>
    %c0_2 = arith.constant 0 : index
    %c0_3 = arith.constant 0 : index
    %8 = vector.load %arg3[%c0_2, %c0_3] : memref<128x32xbf16, #tpu.memory_space<vmem>>, vector<128x32xbf16>
    %cst = arith.constant dense<0.000000e+00> : vector<8x32xf32>
    %9 = tpu.matmul %7, %8, %cst {dimension_numbers = #tpu.dot_dimension_numbers<[1], [0], [0], [1], [0, 0, 1, 1], [], []>} : vector<8x128xbf16>, vector<128x32xbf16>, vector<8x32xf32> -> vector<8x32xf32>
    %c0_4 = arith.constant 0 : index
    %c0_5 = arith.constant 0 : index
    %10 = vector.load %arg4[%c0_4, %c0_5] : memref<8x32xf32, #tpu.memory_space<vmem>>, vector<8x32xf32>
    %11 = arith.addf %9, %10 : vector<8x32xf32>
    %c0_6 = arith.constant 0 : index
    %c0_7 = arith.constant 0 : index
    %12 = vector.load %arg5[%c0_6, %c0_7] : memref<1x32xf32, #tpu.memory_space<vmem>>, vector<1x32xf32>
    %c0_8 = arith.constant 0 : index
    %c0_9 = arith.constant 0 : index
    %13 = vector.load %arg6[%c0_8, %c0_9] : memref<1x32xf32, #tpu.memory_space<vmem>>, vector<1x32xf32>
    %cst_10 = arith.constant dense<0.000000e+00> : vector<8xf32>
    %14 = vector.multi_reduction <add>, %11, %cst_10 [1] : vector<8x32xf32> to vector<8xf32>
    %15 = vector.shape_cast %14 : vector<8xf32> to vector<8x1xf32>
    %cst_11 = arith.constant 3.200000e+01 : f32
    %16 = vector.broadcast %cst_11 : f32 to vector<8x1xf32>
    %17 = arith.divf %15, %16 : vector<8x1xf32>
    %18 = vector.broadcast %17 : vector<8x1xf32> to vector<8x32xf32>
    %19 = arith.subf %11, %18 : vector<8x32xf32>
    %20 = arith.mulf %19, %19 : vector<8x32xf32>
    %cst_12 = arith.constant dense<0.000000e+00> : vector<8xf32>
    %21 = vector.multi_reduction <add>, %20, %cst_12 [1] : vector<8x32xf32> to vector<8xf32>
    %22 = vector.shape_cast %21 : vector<8xf32> to vector<8x1xf32>
    %cst_13 = arith.constant 3.200000e+01 : f32
    %23 = vector.broadcast %cst_13 : f32 to vector<8x1xf32>
    %24 = arith.divf %22, %23 : vector<8x1xf32>
    %25 = vector.broadcast %17 : vector<8x1xf32> to vector<8x32xf32>
    %26 = arith.subf %11, %25 : vector<8x32xf32>
    %cst_14 = arith.constant 9.99999996E-13 : f32
    %27 = vector.broadcast %cst_14 : f32 to vector<8x1xf32>
    %28 = arith.addf %24, %27 : vector<8x1xf32>
    %29 = math.rsqrt %28 : vector<8x1xf32>
    %30 = vector.broadcast %29 : vector<8x1xf32> to vector<8x32xf32>
    %31 = arith.mulf %26, %30 : vector<8x32xf32>
    %32 = vector.broadcast %12 : vector<1x32xf32> to vector<8x32xf32>
    %33 = arith.mulf %31, %32 : vector<8x32xf32>
    %34 = vector.broadcast %13 : vector<1x32xf32> to vector<8x32xf32>
    %35 = arith.addf %33, %34 : vector<8x32xf32>
    %c0_15 = arith.constant 0 : index
    %c0_16 = arith.constant 0 : index
    %c0_17 = arith.constant 0 : index
    %36 = vector.load %arg2[%c0_15, %c0_16, %c0_17] : memref<1x1x8xf32, #tpu.memory_space<vmem>>, vector<1x1x8xf32>
    %cst_18 = arith.constant 5.000000e-01 : f32
    %37 = vector.broadcast %cst_18 : f32 to vector<1x1x8xf32>
    %38 = arith.cmpf ogt, %36, %37 : vector<1x1x8xf32>
    %39 = arith.truncf %35 : vector<8x32xf32> to vector<8x32xbf16>
    %c0_19 = arith.constant 0 : index
    %c0_20 = arith.constant 0 : index
    %c0_21 = arith.constant 0 : index
    %c0_22 = arith.constant 0 : index
    %40 = vector.load %arg7[%c0_19, %c0_20, %c0_21, %c0_22] : memref<2x3x32x32xbf16, #tpu.memory_space<vmem>>, vector<1x1x32x32xbf16>
    %41 = vector.shape_cast %40 : vector<1x1x32x32xbf16> to vector<32x32xbf16>
    %cst_23 = arith.constant dense<0.000000e+00> : vector<8x32xf32>
    %42 = tpu.matmul %39, %41, %cst_23 {dimension_numbers = #tpu.dot_dimension_numbers<[1], [0], [0], [1], [0, 0, 1, 1], [], []>} : vector<8x32xbf16>, vector<32x32xbf16>, vector<8x32xf32> -> vector<8x32xf32>
    %c0_24 = arith.constant 0 : index
    %c0_25 = arith.constant 0 : index
    %c0_26 = arith.constant 0 : index
    %c0_27 = arith.constant 0 : index
    %43 = vector.load %arg8[%c0_24, %c0_25, %c0_26, %c0_27] : memref<2x3x1x32xf32, #tpu.memory_space<vmem>>, vector<1x1x1x32xf32>
    %44 = vector.shape_cast %43 : vector<1x1x1x32xf32> to vector<1x32xf32>
    %45 = vector.broadcast %44 : vector<1x32xf32> to vector<8x32xf32>
    %46 = arith.addf %42, %45 : vector<8x32xf32>
    %c0_28 = arith.constant 0 : index
    %c1 = arith.constant 1 : index
    %c0_29 = arith.constant 0 : index
    %c0_30 = arith.constant 0 : index
    %47 = vector.load %arg7[%c0_28, %c1, %c0_29, %c0_30] : memref<2x3x32x32xbf16, #tpu.memory_space<vmem>>, vector<1x1x32x32xbf16>
    %48 = vector.shape_cast %47 : vector<1x1x32x32xbf16> to vector<32x32xbf16>
    %cst_31 = arith.constant dense<0.000000e+00> : vector<8x32xf32>
    %49 = tpu.matmul %39, %48, %cst_31 {dimension_numbers = #tpu.dot_dimension_numbers<[1], [0], [0], [1], [0, 0, 1, 1], [], []>} : vector<8x32xbf16>, vector<32x32xbf16>, vector<8x32xf32> -> vector<8x32xf32>
    %c0_32 = arith.constant 0 : index
    %c1_33 = arith.constant 1 : index
    %c0_34 = arith.constant 0 : index
    %c0_35 = arith.constant 0 : index
    %50 = vector.load %arg8[%c0_32, %c1_33, %c0_34, %c0_35] : memref<2x3x1x32xf32, #tpu.memory_space<vmem>>, vector<1x1x1x32xf32>
    %51 = vector.shape_cast %50 : vector<1x1x1x32xf32> to vector<1x32xf32>
    %52 = vector.broadcast %51 : vector<1x32xf32> to vector<8x32xf32>
    %53 = arith.addf %49, %52 : vector<8x32xf32>
    %c0_36 = arith.constant 0 : index
    %c2 = arith.constant 2 : index
    %c0_37 = arith.constant 0 : index
    %c0_38 = arith.constant 0 : index
    %54 = vector.load %arg7[%c0_36, %c2, %c0_37, %c0_38] : memref<2x3x32x32xbf16, #tpu.memory_space<vmem>>, vector<1x1x32x32xbf16>
    %55 = vector.shape_cast %54 : vector<1x1x32x32xbf16> to vector<32x32xbf16>
    %cst_39 = arith.constant dense<0.000000e+00> : vector<8x32xf32>
    %56 = tpu.matmul %39, %55, %cst_39 {dimension_numbers = #tpu.dot_dimension_numbers<[1], [0], [0], [1], [0, 0, 1, 1], [], []>} : vector<8x32xbf16>, vector<32x32xbf16>, vector<8x32xf32> -> vector<8x32xf32>
    %c0_40 = arith.constant 0 : index
    %c2_41 = arith.constant 2 : index
    %c0_42 = arith.constant 0 : index
    %c0_43 = arith.constant 0 : index
    %57 = vector.load %arg8[%c0_40, %c2_41, %c0_42, %c0_43] : memref<2x3x1x32xf32, #tpu.memory_space<vmem>>, vector<1x1x1x32xf32>
    %58 = vector.shape_cast %57 : vector<1x1x1x32xf32> to vector<1x32xf32>
    %59 = vector.broadcast %58 : vector<1x32xf32> to vector<8x32xf32>
    %60 = arith.addf %56, %59 : vector<8x32xf32>
    %61 = arith.truncf %46 : vector<8x32xf32> to vector<8x32xbf16>
    %62 = vector.shape_cast %61 : vector<8x32xbf16> to vector<8x4x8xbf16>
    %63 = tpu.transpose %62, [1, 0, 2] : vector<8x4x8xbf16> -> vector<4x8x8xbf16>
    %64 = arith.truncf %53 : vector<8x32xf32> to vector<8x32xbf16>
    %65 = vector.shape_cast %64 : vector<8x32xbf16> to vector<8x4x8xbf16>
    %66 = tpu.transpose %65, [1, 0, 2] : vector<8x4x8xbf16> -> vector<4x8x8xbf16>
    %67 = arith.truncf %60 : vector<8x32xf32> to vector<8x32xbf16>
    %68 = vector.shape_cast %67 : vector<8x32xbf16> to vector<8x4x8xbf16>
    %69 = tpu.transpose %68, [1, 0, 2] : vector<8x4x8xbf16> -> vector<4x8x8xbf16>
    "tpu.trace_start"() <{level = 10 : i32, message = "hqd,hkd->hqk"}> : () -> ()
    %cst_44 = arith.constant dense<0.000000e+00> : vector<4x8x8xf32>
    %70 = tpu.matmul %63, %66, %cst_44 {dimension_numbers = #tpu.dot_dimension_numbers<[2], [2], [1], [1], [0, 0, 0, 1, 1, 1], [0], [0]>} : vector<4x8x8xbf16>, vector<4x8x8xbf16>, vector<4x8x8xf32> -> vector<4x8x8xf32>
    %cst_45 = arith.constant -3.40282347E+38 : f32
    "tpu.trace_stop"() : () -> ()
    %71 = vector.shape_cast %38 : vector<1x1x8xi1> to vector<1x1x8xi1>
    %72 = vector.broadcast %71 : vector<1x1x8xi1> to vector<4x8x8xi1>
    %73 = vector.broadcast %cst_45 : f32 to vector<4x8x8xf32>
    %74 = arith.select %72, %70, %73 : vector<4x8x8xi1>, vector<4x8x8xf32>
    %cst_46 = arith.constant dense<0xFF800000> : vector<4x8xf32>
    %75 = vector.multi_reduction <maximumf>, %74, %cst_46 [2] : vector<4x8x8xf32> to vector<4x8xf32>
    %76 = vector.shape_cast %75 : vector<4x8xf32> to vector<4x8x1xf32>
    %77 = vector.broadcast %76 : vector<4x8x1xf32> to vector<4x8x8xf32>
    %78 = arith.subf %74, %77 : vector<4x8x8xf32>
    %79 = math.exp %78 : vector<4x8x8xf32>
    %cst_47 = arith.constant dense<0.000000e+00> : vector<4x8xf32>
    %80 = vector.multi_reduction <add>, %79, %cst_47 [2] : vector<4x8x8xf32> to vector<4x8xf32>
    %81 = vector.shape_cast %80 : vector<4x8xf32> to vector<4x8x1xf32>
    %82 = tpu.reciprocal %81 {approx = true} : vector<4x8x1xf32> -> vector<4x8x1xf32>
    %83 = vector.broadcast %82 : vector<4x8x1xf32> to vector<4x8x8xf32>
    %84 = arith.mulf %79, %83 : vector<4x8x8xf32>
    %85 = arith.truncf %84 : vector<4x8x8xf32> to vector<4x8x8xbf16>
    "tpu.trace_start"() <{level = 10 : i32, message = "hqk,hkd->hqd"}> : () -> ()
    %cst_48 = arith.constant dense<0.000000e+00> : vector<4x8x8xf32>
    %86 = tpu.matmul %85, %69, %cst_48 {dimension_numbers = #tpu.dot_dimension_numbers<[2], [1], [1], [2], [0, 0, 0, 1, 1, 2], [0], [0]>} : vector<4x8x8xbf16>, vector<4x8x8xbf16>, vector<4x8x8xf32> -> vector<4x8x8xf32>
    "tpu.trace_stop"() : () -> ()
    %87 = tpu.transpose %86, [1, 0, 2] : vector<4x8x8xf32> -> vector<8x4x8xf32>
    %88 = vector.shape_cast %87 : vector<8x4x8xf32> to vector<8x32xf32>
    %89 = arith.truncf %88 : vector<8x32xf32> to vector<8x32xbf16>
    %c0_49 = arith.constant 0 : index
    %c0_50 = arith.constant 0 : index
    %c0_51 = arith.constant 0 : index
    %90 = vector.load %arg9[%c0_49, %c0_50, %c0_51] : memref<2x32x32xbf16, #tpu.memory_space<vmem>>, vector<1x32x32xbf16>
    %91 = vector.shape_cast %90 : vector<1x32x32xbf16> to vector<32x32xbf16>
    %cst_52 = arith.constant dense<0.000000e+00> : vector<8x32xf32>
    %92 = tpu.matmul %89, %91, %cst_52 {dimension_numbers = #tpu.dot_dimension_numbers<[1], [0], [0], [1], [0, 0, 1, 1], [], []>} : vector<8x32xbf16>, vector<32x32xbf16>, vector<8x32xf32> -> vector<8x32xf32>
    %c0_53 = arith.constant 0 : index
    %c0_54 = arith.constant 0 : index
    %c0_55 = arith.constant 0 : index
    %93 = vector.load %arg10[%c0_53, %c0_54, %c0_55] : memref<2x1x32xf32, #tpu.memory_space<vmem>>, vector<1x1x32xf32>
    %94 = vector.shape_cast %93 : vector<1x1x32xf32> to vector<1x32xf32>
    %95 = vector.broadcast %94 : vector<1x32xf32> to vector<8x32xf32>
    %96 = arith.addf %92, %95 : vector<8x32xf32>
    %97 = arith.addf %96, %35 : vector<8x32xf32>
    %c0_56 = arith.constant 0 : index
    %c0_57 = arith.constant 0 : index
    %c0_58 = arith.constant 0 : index
    %98 = vector.load %arg11[%c0_56, %c0_57, %c0_58] : memref<2x1x32xf32, #tpu.memory_space<vmem>>, vector<1x1x32xf32>
    %99 = vector.shape_cast %98 : vector<1x1x32xf32> to vector<1x32xf32>
    %c0_59 = arith.constant 0 : index
    %c0_60 = arith.constant 0 : index
    %c0_61 = arith.constant 0 : index
    %100 = vector.load %arg12[%c0_59, %c0_60, %c0_61] : memref<2x1x32xf32, #tpu.memory_space<vmem>>, vector<1x1x32xf32>
    %101 = vector.shape_cast %100 : vector<1x1x32xf32> to vector<1x32xf32>
    %cst_62 = arith.constant dense<0.000000e+00> : vector<8xf32>
    %102 = vector.multi_reduction <add>, %97, %cst_62 [1] : vector<8x32xf32> to vector<8xf32>
    %103 = vector.shape_cast %102 : vector<8xf32> to vector<8x1xf32>
    %cst_63 = arith.constant 3.200000e+01 : f32
    %104 = vector.broadcast %cst_63 : f32 to vector<8x1xf32>
    %105 = arith.divf %103, %104 : vector<8x1xf32>
    %106 = vector.broadcast %105 : vector<8x1xf32> to vector<8x32xf32>
    %107 = arith.subf %97, %106 : vector<8x32xf32>
    %108 = arith.mulf %107, %107 : vector<8x32xf32>
    %cst_64 = arith.constant dense<0.000000e+00> : vector<8xf32>
    %109 = vector.multi_reduction <add>, %108, %cst_64 [1] : vector<8x32xf32> to vector<8xf32>
    %110 = vector.shape_cast %109 : vector<8xf32> to vector<8x1xf32>
    %cst_65 = arith.constant 3.200000e+01 : f32
    %111 = vector.broadcast %cst_65 : f32 to vector<8x1xf32>
    %112 = arith.divf %110, %111 : vector<8x1xf32>
    %113 = vector.broadcast %105 : vector<8x1xf32> to vector<8x32xf32>
    %114 = arith.subf %97, %113 : vector<8x32xf32>
    %cst_66 = arith.constant 9.99999996E-13 : f32
    %115 = vector.broadcast %cst_66 : f32 to vector<8x1xf32>
    %116 = arith.addf %112, %115 : vector<8x1xf32>
    %117 = math.rsqrt %116 : vector<8x1xf32>
    %118 = vector.broadcast %117 : vector<8x1xf32> to vector<8x32xf32>
    %119 = arith.mulf %114, %118 : vector<8x32xf32>
    %120 = vector.broadcast %99 : vector<1x32xf32> to vector<8x32xf32>
    %121 = arith.mulf %119, %120 : vector<8x32xf32>
    %122 = vector.broadcast %101 : vector<1x32xf32> to vector<8x32xf32>
    %123 = arith.addf %121, %122 : vector<8x32xf32>
    %124 = arith.truncf %123 : vector<8x32xf32> to vector<8x32xbf16>
    %c0_67 = arith.constant 0 : index
    %c0_68 = arith.constant 0 : index
    %c0_69 = arith.constant 0 : index
    %125 = vector.load %arg13[%c0_67, %c0_68, %c0_69] : memref<2x32x128xbf16, #tpu.memory_space<vmem>>, vector<1x32x128xbf16>
    %126 = vector.shape_cast %125 : vector<1x32x128xbf16> to vector<32x128xbf16>
    %cst_70 = arith.constant dense<0.000000e+00> : vector<8x128xf32>
    %127 = tpu.matmul %124, %126, %cst_70 {dimension_numbers = #tpu.dot_dimension_numbers<[1], [0], [0], [1], [0, 0, 1, 1], [], []>} : vector<8x32xbf16>, vector<32x128xbf16>, vector<8x128xf32> -> vector<8x128xf32>
    %c0_71 = arith.constant 0 : index
    %c0_72 = arith.constant 0 : index
    %c0_73 = arith.constant 0 : index
    %128 = vector.load %arg14[%c0_71, %c0_72, %c0_73] : memref<2x1x128xf32, #tpu.memory_space<vmem>>, vector<1x1x128xf32>
    %129 = vector.shape_cast %128 : vector<1x1x128xf32> to vector<1x128xf32>
    %130 = vector.broadcast %129 : vector<1x128xf32> to vector<8x128xf32>
    %131 = arith.addf %127, %130 : vector<8x128xf32>
    %cst_74 = arith.constant 5.000000e-01 : f32
    %132 = vector.broadcast %cst_74 : f32 to vector<8x128xf32>
    %133 = arith.mulf %132, %131 : vector<8x128xf32>
    %cst_75 = arith.constant 4.471500e-02 : f32
    %134 = vector.broadcast %cst_75 : f32 to vector<8x128xf32>
    %135 = arith.mulf %134, %131 : vector<8x128xf32>
    %136 = arith.mulf %135, %131 : vector<8x128xf32>
    %137 = arith.mulf %136, %131 : vector<8x128xf32>
    %138 = arith.addf %131, %137 : vector<8x128xf32>
    %cst_76 = arith.constant 0.797884583 : f32
    %139 = vector.broadcast %cst_76 : f32 to vector<8x128xf32>
    %140 = arith.mulf %139, %138 : vector<8x128xf32>
    %141 = math.tanh %140 : vector<8x128xf32>
    %cst_77 = arith.constant 1.000000e+00 : f32
    %142 = vector.broadcast %cst_77 : f32 to vector<8x128xf32>
    %143 = arith.addf %142, %141 : vector<8x128xf32>
    %144 = arith.mulf %133, %143 : vector<8x128xf32>
    %145 = arith.truncf %144 : vector<8x128xf32> to vector<8x128xbf16>
    %c0_78 = arith.constant 0 : index
    %c0_79 = arith.constant 0 : index
    %c0_80 = arith.constant 0 : index
    %146 = vector.load %arg15[%c0_78, %c0_79, %c0_80] : memref<2x128x32xbf16, #tpu.memory_space<vmem>>, vector<1x128x32xbf16>
    %147 = vector.shape_cast %146 : vector<1x128x32xbf16> to vector<128x32xbf16>
    %cst_81 = arith.constant dense<0.000000e+00> : vector<8x32xf32>
    %148 = tpu.matmul %145, %147, %cst_81 {dimension_numbers = #tpu.dot_dimension_numbers<[1], [0], [0], [1], [0, 0, 1, 1], [], []>} : vector<8x128xbf16>, vector<128x32xbf16>, vector<8x32xf32> -> vector<8x32xf32>
    %c0_82 = arith.constant 0 : index
    %c0_83 = arith.constant 0 : index
    %c0_84 = arith.constant 0 : index
    %149 = vector.load %arg16[%c0_82, %c0_83, %c0_84] : memref<2x1x32xf32, #tpu.memory_space<vmem>>, vector<1x1x32xf32>
    %150 = vector.shape_cast %149 : vector<1x1x32xf32> to vector<1x32xf32>
    %151 = vector.broadcast %150 : vector<1x32xf32> to vector<8x32xf32>
    %152 = arith.addf %148, %151 : vector<8x32xf32>
    %153 = arith.addf %152, %123 : vector<8x32xf32>
    %c0_85 = arith.constant 0 : index
    %c0_86 = arith.constant 0 : index
    %c0_87 = arith.constant 0 : index
    %154 = vector.load %arg17[%c0_85, %c0_86, %c0_87] : memref<2x1x32xf32, #tpu.memory_space<vmem>>, vector<1x1x32xf32>
    %155 = vector.shape_cast %154 : vector<1x1x32xf32> to vector<1x32xf32>
    %c0_88 = arith.constant 0 : index
    %c0_89 = arith.constant 0 : index
    %c0_90 = arith.constant 0 : index
    %156 = vector.load %arg18[%c0_88, %c0_89, %c0_90] : memref<2x1x32xf32, #tpu.memory_space<vmem>>, vector<1x1x32xf32>
    %157 = vector.shape_cast %156 : vector<1x1x32xf32> to vector<1x32xf32>
    %cst_91 = arith.constant dense<0.000000e+00> : vector<8xf32>
    %158 = vector.multi_reduction <add>, %153, %cst_91 [1] : vector<8x32xf32> to vector<8xf32>
    %159 = vector.shape_cast %158 : vector<8xf32> to vector<8x1xf32>
    %cst_92 = arith.constant 3.200000e+01 : f32
    %160 = vector.broadcast %cst_92 : f32 to vector<8x1xf32>
    %161 = arith.divf %159, %160 : vector<8x1xf32>
    %162 = vector.broadcast %161 : vector<8x1xf32> to vector<8x32xf32>
    %163 = arith.subf %153, %162 : vector<8x32xf32>
    %164 = arith.mulf %163, %163 : vector<8x32xf32>
    %cst_93 = arith.constant dense<0.000000e+00> : vector<8xf32>
    %165 = vector.multi_reduction <add>, %164, %cst_93 [1] : vector<8x32xf32> to vector<8xf32>
    %166 = vector.shape_cast %165 : vector<8xf32> to vector<8x1xf32>
    %cst_94 = arith.constant 3.200000e+01 : f32
    %167 = vector.broadcast %cst_94 : f32 to vector<8x1xf32>
    %168 = arith.divf %166, %167 : vector<8x1xf32>
    %169 = vector.broadcast %161 : vector<8x1xf32> to vector<8x32xf32>
    %170 = arith.subf %153, %169 : vector<8x32xf32>
    %cst_95 = arith.constant 9.99999996E-13 : f32
    %171 = vector.broadcast %cst_95 : f32 to vector<8x1xf32>
    %172 = arith.addf %168, %171 : vector<8x1xf32>
    %173 = math.rsqrt %172 : vector<8x1xf32>
    %174 = vector.broadcast %173 : vector<8x1xf32> to vector<8x32xf32>
    %175 = arith.mulf %170, %174 : vector<8x32xf32>
    %176 = vector.broadcast %155 : vector<1x32xf32> to vector<8x32xf32>
    %177 = arith.mulf %175, %176 : vector<8x32xf32>
    %178 = vector.broadcast %157 : vector<1x32xf32> to vector<8x32xf32>
    %179 = arith.addf %177, %178 : vector<8x32xf32>
    %180 = arith.truncf %179 : vector<8x32xf32> to vector<8x32xbf16>
    %c1_96 = arith.constant 1 : index
    %c0_97 = arith.constant 0 : index
    %c0_98 = arith.constant 0 : index
    %c0_99 = arith.constant 0 : index
    %181 = vector.load %arg7[%c1_96, %c0_97, %c0_98, %c0_99] : memref<2x3x32x32xbf16, #tpu.memory_space<vmem>>, vector<1x1x32x32xbf16>
    %182 = vector.shape_cast %181 : vector<1x1x32x32xbf16> to vector<32x32xbf16>
    %cst_100 = arith.constant dense<0.000000e+00> : vector<8x32xf32>
    %183 = tpu.matmul %180, %182, %cst_100 {dimension_numbers = #tpu.dot_dimension_numbers<[1], [0], [0], [1], [0, 0, 1, 1], [], []>} : vector<8x32xbf16>, vector<32x32xbf16>, vector<8x32xf32> -> vector<8x32xf32>
    %c1_101 = arith.constant 1 : index
    %c0_102 = arith.constant 0 : index
    %c0_103 = arith.constant 0 : index
    %c0_104 = arith.constant 0 : index
    %184 = vector.load %arg8[%c1_101, %c0_102, %c0_103, %c0_104] : memref<2x3x1x32xf32, #tpu.memory_space<vmem>>, vector<1x1x1x32xf32>
    %185 = vector.shape_cast %184 : vector<1x1x1x32xf32> to vector<1x32xf32>
    %186 = vector.broadcast %185 : vector<1x32xf32> to vector<8x32xf32>
    %187 = arith.addf %183, %186 : vector<8x32xf32>
    %c1_105 = arith.constant 1 : index
    %c1_106 = arith.constant 1 : index
    %c0_107 = arith.constant 0 : index
    %c0_108 = arith.constant 0 : index
    %188 = vector.load %arg7[%c1_105, %c1_106, %c0_107, %c0_108] : memref<2x3x32x32xbf16, #tpu.memory_space<vmem>>, vector<1x1x32x32xbf16>
    %189 = vector.shape_cast %188 : vector<1x1x32x32xbf16> to vector<32x32xbf16>
    %cst_109 = arith.constant dense<0.000000e+00> : vector<8x32xf32>
    %190 = tpu.matmul %180, %189, %cst_109 {dimension_numbers = #tpu.dot_dimension_numbers<[1], [0], [0], [1], [0, 0, 1, 1], [], []>} : vector<8x32xbf16>, vector<32x32xbf16>, vector<8x32xf32> -> vector<8x32xf32>
    %c1_110 = arith.constant 1 : index
    %c1_111 = arith.constant 1 : index
    %c0_112 = arith.constant 0 : index
    %c0_113 = arith.constant 0 : index
    %191 = vector.load %arg8[%c1_110, %c1_111, %c0_112, %c0_113] : memref<2x3x1x32xf32, #tpu.memory_space<vmem>>, vector<1x1x1x32xf32>
    %192 = vector.shape_cast %191 : vector<1x1x1x32xf32> to vector<1x32xf32>
    %193 = vector.broadcast %192 : vector<1x32xf32> to vector<8x32xf32>
    %194 = arith.addf %190, %193 : vector<8x32xf32>
    %c1_114 = arith.constant 1 : index
    %c2_115 = arith.constant 2 : index
    %c0_116 = arith.constant 0 : index
    %c0_117 = arith.constant 0 : index
    %195 = vector.load %arg7[%c1_114, %c2_115, %c0_116, %c0_117] : memref<2x3x32x32xbf16, #tpu.memory_space<vmem>>, vector<1x1x32x32xbf16>
    %196 = vector.shape_cast %195 : vector<1x1x32x32xbf16> to vector<32x32xbf16>
    %cst_118 = arith.constant dense<0.000000e+00> : vector<8x32xf32>
    %197 = tpu.matmul %180, %196, %cst_118 {dimension_numbers = #tpu.dot_dimension_numbers<[1], [0], [0], [1], [0, 0, 1, 1], [], []>} : vector<8x32xbf16>, vector<32x32xbf16>, vector<8x32xf32> -> vector<8x32xf32>
    %c1_119 = arith.constant 1 : index
    %c2_120 = arith.constant 2 : index
    %c0_121 = arith.constant 0 : index
    %c0_122 = arith.constant 0 : index
    %198 = vector.load %arg8[%c1_119, %c2_120, %c0_121, %c0_122] : memref<2x3x1x32xf32, #tpu.memory_space<vmem>>, vector<1x1x1x32xf32>
    %199 = vector.shape_cast %198 : vector<1x1x1x32xf32> to vector<1x32xf32>
    %200 = vector.broadcast %199 : vector<1x32xf32> to vector<8x32xf32>
    %201 = arith.addf %197, %200 : vector<8x32xf32>
    %202 = arith.truncf %187 : vector<8x32xf32> to vector<8x32xbf16>
    %203 = vector.shape_cast %202 : vector<8x32xbf16> to vector<8x4x8xbf16>
    %204 = tpu.transpose %203, [1, 0, 2] : vector<8x4x8xbf16> -> vector<4x8x8xbf16>
    %205 = arith.truncf %194 : vector<8x32xf32> to vector<8x32xbf16>
    %206 = vector.shape_cast %205 : vector<8x32xbf16> to vector<8x4x8xbf16>
    %207 = tpu.transpose %206, [1, 0, 2] : vector<8x4x8xbf16> -> vector<4x8x8xbf16>
    %208 = arith.truncf %201 : vector<8x32xf32> to vector<8x32xbf16>
    %209 = vector.shape_cast %208 : vector<8x32xbf16> to vector<8x4x8xbf16>
    %210 = tpu.transpose %209, [1, 0, 2] : vector<8x4x8xbf16> -> vector<4x8x8xbf16>
    "tpu.trace_start"() <{level = 10 : i32, message = "hqd,hkd->hqk"}> : () -> ()
    %cst_123 = arith.constant dense<0.000000e+00> : vector<4x8x8xf32>
    %211 = tpu.matmul %204, %207, %cst_123 {dimension_numbers = #tpu.dot_dimension_numbers<[2], [2], [1], [1], [0, 0, 0, 1, 1, 1], [0], [0]>} : vector<4x8x8xbf16>, vector<4x8x8xbf16>, vector<4x8x8xf32> -> vector<4x8x8xf32>
    %cst_124 = arith.constant -3.40282347E+38 : f32
    "tpu.trace_stop"() : () -> ()
    %212 = vector.shape_cast %38 : vector<1x1x8xi1> to vector<1x1x8xi1>
    %213 = vector.broadcast %212 : vector<1x1x8xi1> to vector<4x8x8xi1>
    %214 = vector.broadcast %cst_124 : f32 to vector<4x8x8xf32>
    %215 = arith.select %213, %211, %214 : vector<4x8x8xi1>, vector<4x8x8xf32>
    %cst_125 = arith.constant dense<0xFF800000> : vector<4x8xf32>
    %216 = vector.multi_reduction <maximumf>, %215, %cst_125 [2] : vector<4x8x8xf32> to vector<4x8xf32>
    %217 = vector.shape_cast %216 : vector<4x8xf32> to vector<4x8x1xf32>
    %218 = vector.broadcast %217 : vector<4x8x1xf32> to vector<4x8x8xf32>
    %219 = arith.subf %215, %218 : vector<4x8x8xf32>
    %220 = math.exp %219 : vector<4x8x8xf32>
    %cst_126 = arith.constant dense<0.000000e+00> : vector<4x8xf32>
    %221 = vector.multi_reduction <add>, %220, %cst_126 [2] : vector<4x8x8xf32> to vector<4x8xf32>
    %222 = vector.shape_cast %221 : vector<4x8xf32> to vector<4x8x1xf32>
    %223 = tpu.reciprocal %222 {approx = true} : vector<4x8x1xf32> -> vector<4x8x1xf32>
    %224 = vector.broadcast %223 : vector<4x8x1xf32> to vector<4x8x8xf32>
    %225 = arith.mulf %220, %224 : vector<4x8x8xf32>
    %226 = arith.truncf %225 : vector<4x8x8xf32> to vector<4x8x8xbf16>
    "tpu.trace_start"() <{level = 10 : i32, message = "hqk,hkd->hqd"}> : () -> ()
    %cst_127 = arith.constant dense<0.000000e+00> : vector<4x8x8xf32>
    %227 = tpu.matmul %226, %210, %cst_127 {dimension_numbers = #tpu.dot_dimension_numbers<[2], [1], [1], [2], [0, 0, 0, 1, 1, 2], [0], [0]>} : vector<4x8x8xbf16>, vector<4x8x8xbf16>, vector<4x8x8xf32> -> vector<4x8x8xf32>
    "tpu.trace_stop"() : () -> ()
    %228 = tpu.transpose %227, [1, 0, 2] : vector<4x8x8xf32> -> vector<8x4x8xf32>
    %229 = vector.shape_cast %228 : vector<8x4x8xf32> to vector<8x32xf32>
    %230 = arith.truncf %229 : vector<8x32xf32> to vector<8x32xbf16>
    %c1_128 = arith.constant 1 : index
    %c0_129 = arith.constant 0 : index
    %c0_130 = arith.constant 0 : index
    %231 = vector.load %arg9[%c1_128, %c0_129, %c0_130] : memref<2x32x32xbf16, #tpu.memory_space<vmem>>, vector<1x32x32xbf16>
    %232 = vector.shape_cast %231 : vector<1x32x32xbf16> to vector<32x32xbf16>
    %cst_131 = arith.constant dense<0.000000e+00> : vector<8x32xf32>
    %233 = tpu.matmul %230, %232, %cst_131 {dimension_numbers = #tpu.dot_dimension_numbers<[1], [0], [0], [1], [0, 0, 1, 1], [], []>} : vector<8x32xbf16>, vector<32x32xbf16>, vector<8x32xf32> -> vector<8x32xf32>
    %c1_132 = arith.constant 1 : index
    %c0_133 = arith.constant 0 : index
    %c0_134 = arith.constant 0 : index
    %234 = vector.load %arg10[%c1_132, %c0_133, %c0_134] : memref<2x1x32xf32, #tpu.memory_space<vmem>>, vector<1x1x32xf32>
    %235 = vector.shape_cast %234 : vector<1x1x32xf32> to vector<1x32xf32>
    %236 = vector.broadcast %235 : vector<1x32xf32> to vector<8x32xf32>
    %237 = arith.addf %233, %236 : vector<8x32xf32>
    %238 = arith.addf %237, %179 : vector<8x32xf32>
    %c1_135 = arith.constant 1 : index
    %c0_136 = arith.constant 0 : index
    %c0_137 = arith.constant 0 : index
    %239 = vector.load %arg11[%c1_135, %c0_136, %c0_137] : memref<2x1x32xf32, #tpu.memory_space<vmem>>, vector<1x1x32xf32>
    %240 = vector.shape_cast %239 : vector<1x1x32xf32> to vector<1x32xf32>
    %c1_138 = arith.constant 1 : index
    %c0_139 = arith.constant 0 : index
    %c0_140 = arith.constant 0 : index
    %241 = vector.load %arg12[%c1_138, %c0_139, %c0_140] : memref<2x1x32xf32, #tpu.memory_space<vmem>>, vector<1x1x32xf32>
    %242 = vector.shape_cast %241 : vector<1x1x32xf32> to vector<1x32xf32>
    %cst_141 = arith.constant dense<0.000000e+00> : vector<8xf32>
    %243 = vector.multi_reduction <add>, %238, %cst_141 [1] : vector<8x32xf32> to vector<8xf32>
    %244 = vector.shape_cast %243 : vector<8xf32> to vector<8x1xf32>
    %cst_142 = arith.constant 3.200000e+01 : f32
    %245 = vector.broadcast %cst_142 : f32 to vector<8x1xf32>
    %246 = arith.divf %244, %245 : vector<8x1xf32>
    %247 = vector.broadcast %246 : vector<8x1xf32> to vector<8x32xf32>
    %248 = arith.subf %238, %247 : vector<8x32xf32>
    %249 = arith.mulf %248, %248 : vector<8x32xf32>
    %cst_143 = arith.constant dense<0.000000e+00> : vector<8xf32>
    %250 = vector.multi_reduction <add>, %249, %cst_143 [1] : vector<8x32xf32> to vector<8xf32>
    %251 = vector.shape_cast %250 : vector<8xf32> to vector<8x1xf32>
    %cst_144 = arith.constant 3.200000e+01 : f32
    %252 = vector.broadcast %cst_144 : f32 to vector<8x1xf32>
    %253 = arith.divf %251, %252 : vector<8x1xf32>
    %254 = vector.broadcast %246 : vector<8x1xf32> to vector<8x32xf32>
    %255 = arith.subf %238, %254 : vector<8x32xf32>
    %cst_145 = arith.constant 9.99999996E-13 : f32
    %256 = vector.broadcast %cst_145 : f32 to vector<8x1xf32>
    %257 = arith.addf %253, %256 : vector<8x1xf32>
    %258 = math.rsqrt %257 : vector<8x1xf32>
    %259 = vector.broadcast %258 : vector<8x1xf32> to vector<8x32xf32>
    %260 = arith.mulf %255, %259 : vector<8x32xf32>
    %261 = vector.broadcast %240 : vector<1x32xf32> to vector<8x32xf32>
    %262 = arith.mulf %260, %261 : vector<8x32xf32>
    %263 = vector.broadcast %242 : vector<1x32xf32> to vector<8x32xf32>
    %264 = arith.addf %262, %263 : vector<8x32xf32>
    %265 = arith.truncf %264 : vector<8x32xf32> to vector<8x32xbf16>
    %c1_146 = arith.constant 1 : index
    %c0_147 = arith.constant 0 : index
    %c0_148 = arith.constant 0 : index
    %266 = vector.load %arg13[%c1_146, %c0_147, %c0_148] : memref<2x32x128xbf16, #tpu.memory_space<vmem>>, vector<1x32x128xbf16>
    %267 = vector.shape_cast %266 : vector<1x32x128xbf16> to vector<32x128xbf16>
    %cst_149 = arith.constant dense<0.000000e+00> : vector<8x128xf32>
    %268 = tpu.matmul %265, %267, %cst_149 {dimension_numbers = #tpu.dot_dimension_numbers<[1], [0], [0], [1], [0, 0, 1, 1], [], []>} : vector<8x32xbf16>, vector<32x128xbf16>, vector<8x128xf32> -> vector<8x128xf32>
    %c1_150 = arith.constant 1 : index
    %c0_151 = arith.constant 0 : index
    %c0_152 = arith.constant 0 : index
    %269 = vector.load %arg14[%c1_150, %c0_151, %c0_152] : memref<2x1x128xf32, #tpu.memory_space<vmem>>, vector<1x1x128xf32>
    %270 = vector.shape_cast %269 : vector<1x1x128xf32> to vector<1x128xf32>
    %271 = vector.broadcast %270 : vector<1x128xf32> to vector<8x128xf32>
    %272 = arith.addf %268, %271 : vector<8x128xf32>
    %cst_153 = arith.constant 5.000000e-01 : f32
    %273 = vector.broadcast %cst_153 : f32 to vector<8x128xf32>
    %274 = arith.mulf %273, %272 : vector<8x128xf32>
    %cst_154 = arith.constant 4.471500e-02 : f32
    %275 = vector.broadcast %cst_154 : f32 to vector<8x128xf32>
    %276 = arith.mulf %275, %272 : vector<8x128xf32>
    %277 = arith.mulf %276, %272 : vector<8x128xf32>
    %278 = arith.mulf %277, %272 : vector<8x128xf32>
    %279 = arith.addf %272, %278 : vector<8x128xf32>
    %cst_155 = arith.constant 0.797884583 : f32
    %280 = vector.broadcast %cst_155 : f32 to vector<8x128xf32>
    %281 = arith.mulf %280, %279 : vector<8x128xf32>
    %282 = math.tanh %281 : vector<8x128xf32>
    %cst_156 = arith.constant 1.000000e+00 : f32
    %283 = vector.broadcast %cst_156 : f32 to vector<8x128xf32>
    %284 = arith.addf %283, %282 : vector<8x128xf32>
    %285 = arith.mulf %274, %284 : vector<8x128xf32>
    %286 = arith.truncf %285 : vector<8x128xf32> to vector<8x128xbf16>
    %c1_157 = arith.constant 1 : index
    %c0_158 = arith.constant 0 : index
    %c0_159 = arith.constant 0 : index
    %287 = vector.load %arg15[%c1_157, %c0_158, %c0_159] : memref<2x128x32xbf16, #tpu.memory_space<vmem>>, vector<1x128x32xbf16>
    %288 = vector.shape_cast %287 : vector<1x128x32xbf16> to vector<128x32xbf16>
    %cst_160 = arith.constant dense<0.000000e+00> : vector<8x32xf32>
    %289 = tpu.matmul %286, %288, %cst_160 {dimension_numbers = #tpu.dot_dimension_numbers<[1], [0], [0], [1], [0, 0, 1, 1], [], []>} : vector<8x128xbf16>, vector<128x32xbf16>, vector<8x32xf32> -> vector<8x32xf32>
    %c1_161 = arith.constant 1 : index
    %c0_162 = arith.constant 0 : index
    %c0_163 = arith.constant 0 : index
    %290 = vector.load %arg16[%c1_161, %c0_162, %c0_163] : memref<2x1x32xf32, #tpu.memory_space<vmem>>, vector<1x1x32xf32>
    %291 = vector.shape_cast %290 : vector<1x1x32xf32> to vector<1x32xf32>
    %292 = vector.broadcast %291 : vector<1x32xf32> to vector<8x32xf32>
    %293 = arith.addf %289, %292 : vector<8x32xf32>
    %294 = arith.addf %293, %264 : vector<8x32xf32>
    %c1_164 = arith.constant 1 : index
    %c0_165 = arith.constant 0 : index
    %c0_166 = arith.constant 0 : index
    %295 = vector.load %arg17[%c1_164, %c0_165, %c0_166] : memref<2x1x32xf32, #tpu.memory_space<vmem>>, vector<1x1x32xf32>
    %296 = vector.shape_cast %295 : vector<1x1x32xf32> to vector<1x32xf32>
    %c1_167 = arith.constant 1 : index
    %c0_168 = arith.constant 0 : index
    %c0_169 = arith.constant 0 : index
    %297 = vector.load %arg18[%c1_167, %c0_168, %c0_169] : memref<2x1x32xf32, #tpu.memory_space<vmem>>, vector<1x1x32xf32>
    %298 = vector.shape_cast %297 : vector<1x1x32xf32> to vector<1x32xf32>
    %cst_170 = arith.constant dense<0.000000e+00> : vector<8xf32>
    %299 = vector.multi_reduction <add>, %294, %cst_170 [1] : vector<8x32xf32> to vector<8xf32>
    %300 = vector.shape_cast %299 : vector<8xf32> to vector<8x1xf32>
    %cst_171 = arith.constant 3.200000e+01 : f32
    %301 = vector.broadcast %cst_171 : f32 to vector<8x1xf32>
    %302 = arith.divf %300, %301 : vector<8x1xf32>
    %303 = vector.broadcast %302 : vector<8x1xf32> to vector<8x32xf32>
    %304 = arith.subf %294, %303 : vector<8x32xf32>
    %305 = arith.mulf %304, %304 : vector<8x32xf32>
    %cst_172 = arith.constant dense<0.000000e+00> : vector<8xf32>
    %306 = vector.multi_reduction <add>, %305, %cst_172 [1] : vector<8x32xf32> to vector<8xf32>
    %307 = vector.shape_cast %306 : vector<8xf32> to vector<8x1xf32>
    %cst_173 = arith.constant 3.200000e+01 : f32
    %308 = vector.broadcast %cst_173 : f32 to vector<8x1xf32>
    %309 = arith.divf %307, %308 : vector<8x1xf32>
    %310 = vector.broadcast %302 : vector<8x1xf32> to vector<8x32xf32>
    %311 = arith.subf %294, %310 : vector<8x32xf32>
    %cst_174 = arith.constant 9.99999996E-13 : f32
    %312 = vector.broadcast %cst_174 : f32 to vector<8x1xf32>
    %313 = arith.addf %309, %312 : vector<8x1xf32>
    %314 = math.rsqrt %313 : vector<8x1xf32>
    %315 = vector.broadcast %314 : vector<8x1xf32> to vector<8x32xf32>
    %316 = arith.mulf %311, %315 : vector<8x32xf32>
    %317 = vector.broadcast %296 : vector<1x32xf32> to vector<8x32xf32>
    %318 = arith.mulf %316, %317 : vector<8x32xf32>
    %319 = vector.broadcast %298 : vector<1x32xf32> to vector<8x32xf32>
    %320 = arith.addf %318, %319 : vector<8x32xf32>
    %321 = vector.extract_strided_slice %320 {offsets = [0, 0], sizes = [1, 32], strides = [1, 1]} : vector<8x32xf32> to vector<1x32xf32>
    %322 = arith.truncf %321 : vector<1x32xf32> to vector<1x32xbf16>
    %c0_175 = arith.constant 0 : index
    %c0_176 = arith.constant 0 : index
    %323 = vector.load %arg19[%c0_175, %c0_176] : memref<32x32xbf16, #tpu.memory_space<vmem>>, vector<32x32xbf16>
    %cst_177 = arith.constant dense<0.000000e+00> : vector<1x32xf32>
    %324 = tpu.matmul %322, %323, %cst_177 {dimension_numbers = #tpu.dot_dimension_numbers<[1], [0], [0], [1], [0, 0, 1, 1], [], []>} : vector<1x32xbf16>, vector<32x32xbf16>, vector<1x32xf32> -> vector<1x32xf32>
    %c0_178 = arith.constant 0 : index
    %c0_179 = arith.constant 0 : index
    %325 = vector.load %arg20[%c0_178, %c0_179] : memref<1x32xf32, #tpu.memory_space<vmem>>, vector<1x32xf32>
    %326 = arith.addf %324, %325 : vector<1x32xf32>
    %cst_180 = arith.constant 0.000000e+00 : f32
    %327 = vector.broadcast %cst_180 : f32 to vector<1x32xf32>
    %328 = arith.maximumf %326, %327 : vector<1x32xf32>
    %329 = arith.truncf %328 : vector<1x32xf32> to vector<1x32xbf16>
    %c0_181 = arith.constant 0 : index
    %c0_182 = arith.constant 0 : index
    %330 = vector.load %arg21[%c0_181, %c0_182] : memref<32x128xbf16, #tpu.memory_space<vmem>>, vector<32x128xbf16>
    %cst_183 = arith.constant dense<0.000000e+00> : vector<1x128xf32>
    %331 = tpu.matmul %329, %330, %cst_183 {dimension_numbers = #tpu.dot_dimension_numbers<[1], [0], [0], [1], [0, 0, 1, 1], [], []>} : vector<1x32xbf16>, vector<32x128xbf16>, vector<1x128xf32> -> vector<1x128xf32>
    %c0_184 = arith.constant 0 : index
    %c0_185 = arith.constant 0 : index
    %332 = vector.load %arg22[%c0_184, %c0_185] : memref<1x128xf32, #tpu.memory_space<vmem>>, vector<1x128xf32>
    %333 = arith.addf %331, %332 : vector<1x128xf32>
    %334 = vector.shape_cast %333 : vector<1x128xf32> to vector<1x1x128xf32>
    %c0_186 = arith.constant 0 : index
    %c0_187 = arith.constant 0 : index
    %c0_188 = arith.constant 0 : index
    %335 = vector.load %arg23[%c0_186, %c0_187, %c0_188] : memref<1x1x128xf32, #tpu.memory_space<vmem>>, vector<1x1x128xf32>
    tpu.vector_store %arg23[%c0_186, %c0_187, %c0_188], %334 {strides = array<i32>} : memref<1x1x128xf32, #tpu.memory_space<vmem>>, vector<1x1x128xf32>,
    return
  }
  func.func @transform_0(%arg0: i32) -> (i32, i32, i32) {
    %c0_i32 = arith.constant 0 : i32
    %c0_i32_0 = arith.constant 0 : i32
    %c0_i32_1 = arith.constant 0 : i32
    return %arg0, %c0_i32, %c0_i32_0 : i32, i32, i32
  }
  func.func @transform_1(%arg0: i32) -> (i32, i32, i32) {
    %c0_i32 = arith.constant 0 : i32
    %c0_i32_0 = arith.constant 0 : i32
    %c0_i32_1 = arith.constant 0 : i32
    return %arg0, %c0_i32, %c0_i32_0 : i32, i32, i32
  }
  func.func @transform_2(%arg0: i32) -> (i32, i32) {
    %c0_i32 = arith.constant 0 : i32
    %c0_i32_0 = arith.constant 0 : i32
    %c0_i32_1 = arith.constant 0 : i32
    return %c0_i32, %c0_i32_0 : i32, i32
  }
  func.func @transform_3(%arg0: i32) -> (i32, i32) {
    %c0_i32 = arith.constant 0 : i32
    %c0_i32_0 = arith.constant 0 : i32
    %c0_i32_1 = arith.constant 0 : i32
    return %c0_i32, %c0_i32_0 : i32, i32
  }
  func.func @transform_4(%arg0: i32) -> (i32, i32) {
    %c0_i32 = arith.constant 0 : i32
    %c0_i32_0 = arith.constant 0 : i32
    %c0_i32_1 = arith.constant 0 : i32
    return %c0_i32, %c0_i32_0 : i32, i32
  }
  func.func @transform_5(%arg0: i32) -> (i32, i32) {
    %c0_i32 = arith.constant 0 : i32
    %c0_i32_0 = arith.constant 0 : i32
    %c0_i32_1 = arith.constant 0 : i32
    return %c0_i32, %c0_i32_0 : i32, i32
  }
  func.func @transform_6(%arg0: i32) -> (i32, i32, i32, i32) {
    %c0_i32 = arith.constant 0 : i32
    %c0_i32_0 = arith.constant 0 : i32
    %c0_i32_1 = arith.constant 0 : i32
    %c0_i32_2 = arith.constant 0 : i32
    %c0_i32_3 = arith.constant 0 : i32
    return %c0_i32, %c0_i32_0, %c0_i32_1, %c0_i32_2 : i32, i32, i32, i32
  }
  func.func @transform_7(%arg0: i32) -> (i32, i32, i32, i32) {
    %c0_i32 = arith.constant 0 : i32
    %c0_i32_0 = arith.constant 0 : i32
    %c0_i32_1 = arith.constant 0 : i32
    %c0_i32_2 = arith.constant 0 : i32
    %c0_i32_3 = arith.constant 0 : i32
    return %c0_i32, %c0_i32_0, %c0_i32_1, %c0_i32_2 : i32, i32, i32, i32
  }
  func.func @transform_8(%arg0: i32) -> (i32, i32, i32) {
    %c0_i32 = arith.constant 0 : i32
    %c0_i32_0 = arith.constant 0 : i32
    %c0_i32_1 = arith.constant 0 : i32
    %c0_i32_2 = arith.constant 0 : i32
    return %c0_i32, %c0_i32_0, %c0_i32_1 : i32, i32, i32
  }
  func.func @transform_9(%arg0: i32) -> (i32, i32, i32) {
    %c0_i32 = arith.constant 0 : i32
    %c0_i32_0 = arith.constant 0 : i32
    %c0_i32_1 = arith.constant 0 : i32
    %c0_i32_2 = arith.constant 0 : i32
    return %c0_i32, %c0_i32_0, %c0_i32_1 : i32, i32, i32
  }
  func.func @transform_10(%arg0: i32) -> (i32, i32, i32) {
    %c0_i32 = arith.constant 0 : i32
    %c0_i32_0 = arith.constant 0 : i32
    %c0_i32_1 = arith.constant 0 : i32
    %c0_i32_2 = arith.constant 0 : i32
    return %c0_i32, %c0_i32_0, %c0_i32_1 : i32, i32, i32
  }
  func.func @transform_11(%arg0: i32) -> (i32, i32, i32) {
    %c0_i32 = arith.constant 0 : i32
    %c0_i32_0 = arith.constant 0 : i32
    %c0_i32_1 = arith.constant 0 : i32
    %c0_i32_2 = arith.constant 0 : i32
    return %c0_i32, %c0_i32_0, %c0_i32_1 : i32, i32, i32
  }
  func.func @transform_12(%arg0: i32) -> (i32, i32, i32) {
    %c0_i32 = arith.constant 0 : i32
    %c0_i32_0 = arith.constant 0 : i32
    %c0_i32_1 = arith.constant 0 : i32
    %c0_i32_2 = arith.constant 0 : i32
    return %c0_i32, %c0_i32_0, %c0_i32_1 : i32, i32, i32
  }
  func.func @transform_13(%arg0: i32) -> (i32, i32, i32) {
    %c0_i32 = arith.constant 0 : i32
    %c0_i32_0 = arith.constant 0 : i32
    %c0_i32_1 = arith.constant 0 : i32
    %c0_i32_2 = arith.constant 0 : i32
    return %c0_i32, %c0_i32_0, %c0_i32_1 : i32, i32, i32
  }
  func.func @transform_14(%arg0: i32) -> (i32, i32, i32) {
    %c0_i32 = arith.constant 0 : i32
    %c0_i32_0 = arith.constant 0 : i32
    %c0_i32_1 = arith.constant 0 : i32
    %c0_i32_2 = arith.constant 0 : i32
    return %c0_i32, %c0_i32_0, %c0_i32_1 : i32, i32, i32
  }
  func.func @transform_15(%arg0: i32) -> (i32, i32, i32) {
    %c0_i32 = arith.constant 0 : i32
    %c0_i32_0 = arith.constant 0 : i32
    %c0_i32_1 = arith.constant 0 : i32
    %c0_i32_2 = arith.constant 0 : i32
    return %c0_i32, %c0_i32_0, %c0_i32_1 : i32, i32, i32
  }
  func.func @transform_16(%arg0: i32) -> (i32, i32, i32) {
    %c0_i32 = arith.constant 0 : i32
    %c0_i32_0 = arith.constant 0 : i32
    %c0_i32_1 = arith.constant 0 : i32
    %c0_i32_2 = arith.constant 0 : i32
    return %c0_i32, %c0_i32_0, %c0_i32_1 : i32, i32, i32
  }
  func.func @transform_17(%arg0: i32) -> (i32, i32, i32) {
    %c0_i32 = arith.constant 0 : i32
    %c0_i32_0 = arith.constant 0 : i32
    %c0_i32_1 = arith.constant 0 : i32
    %c0_i32_2 = arith.constant 0 : i32
    return %c0_i32, %c0_i32_0, %c0_i32_1 : i32, i32, i32
  }
  func.func @transform_18(%arg0: i32) -> (i32, i32) {
    %c0_i32 = arith.constant 0 : i32
    %c0_i32_0 = arith.constant 0 : i32
    %c0_i32_1 = arith.constant 0 : i32
    return %c0_i32, %c0_i32_0 : i32, i32
  }
  func.func @transform_19(%arg0: i32) -> (i32, i32) {
    %c0_i32 = arith.constant 0 : i32
    %c0_i32_0 = arith.constant 0 : i32
    %c0_i32_1 = arith.constant 0 : i32
    return %c0_i32, %c0_i32_0 : i32, i32
  }
  func.func @transform_20(%arg0: i32) -> (i32, i32) {
    %c0_i32 = arith.constant 0 : i32
    %c0_i32_0 = arith.constant 0 : i32
    %c0_i32_1 = arith.constant 0 : i32
    return %c0_i32, %c0_i32_0 : i32, i32
  }
  func.func @transform_21(%arg0: i32) -> (i32, i32) {
    %c0_i32 = arith.constant 0 : i32
    %c0_i32_0 = arith.constant 0 : i32
    %c0_i32_1 = arith.constant 0 : i32
    return %c0_i32, %c0_i32_0 : i32, i32
  }
  func.func @transform_22(%arg0: i32) -> (i32, i32, i32) {
    %c0_i32 = arith.constant 0 : i32
    %c0_i32_0 = arith.constant 0 : i32
    %c0_i32_1 = arith.constant 0 : i32
    return %arg0, %c0_i32, %c0_i32_0 : i32, i32, i32
  }
}

</mosaic_0001>

<bundles_post_ra>
// kernel: distilbert_class_forward.1
= control target key start
LH: loop header
LB: loop body
LE: loop exit
PB: predicated region body
PF: predicated region fallthrough
CT: control target
= control target key end

     0   :  { %s5882_s0 = inlined_call_operand.vmem [shape: s32[2,8,1], index: 0, kind: input, shape index: {}]   ;;  %s5883_s1 = inlined_call_operand.vmem [shape: f32[2,1,8], index: 1, kind: input, shape index: {}]   ;;  %s5884_s2 = inlined_call_operand.vmem [shape: bf16[128,32], index: 2, kind: input, shape index: {}]   ;;  %s5885_s3 = inlined_call_operand.vmem [shape: f32[8,32], index: 3, kind: input, shape index: {}]   ;;  %s5886_s4 = inlined_call_operand.vmem [shape: f32[1,32], index: 4, kind: input, shape index: {}]   ;;  %s5887_s5 = inlined_call_operand.vmem [shape: f32[1,32], index: 5, kind: input, shape index: {}]   ;;  %s5888_s6 = inlined_call_operand.vmem [shape: bf16[2,3,32,32], index: 6, kind: input, shape index: {}]   ;;  %s5889_s7 = inlined_call_operand.vmem [shape: f32[2,3,1,32], index: 7, kind: input, shape index: {}]   ;;  %s5890_s8 = inlined_call_operand.vmem [shape: bf16[2,32,32], index: 8, kind: input, shape index: {}]   ;;  %s5891_s9 = inlined_call_operand.vmem [shape: f32[2,1,32], index: 9, kind: input, shape index: {}]   ;;  %s5892_s10 = inlined_call_operand.vmem [shape: f32[2,1,32], index: 10, kind: input, shape index: {}]   ;;  %s5893_s11 = inlined_call_operand.vmem [shape: f32[2,1,32], index: 11, kind: input, shape index: {}]   ;;  %s5894_s12 = inlined_call_operand.vmem [shape: bf16[2,32,128], index: 12, kind: input, shape index: {}]   ;;  %s5895_s13 = inlined_call_operand.vmem [shape: f32[2,1,128], index: 13, kind: input, shape index: {}]   ;;  %s5896_s14 = inlined_call_operand.vmem [shape: bf16[2,128,32], index: 14, kind: input, shape index: {}]   ;;  %s5897_s15 = inlined_call_operand.vmem [shape: f32[2,1,32], index: 15, kind: input, shape index: {}]   ;;  %s5898_s16 = inlined_call_operand.vmem [shape: f32[2,1,32], index: 16, kind: input, shape index: {}]   ;;  %s5899_s17 = inlined_call_operand.vmem [shape: f32[2,1,32], index: 17, kind: input, shape index: {}]   ;;  %s5900_s18 = inlined_call_operand.vmem [shape: bf16[32,32], index: 18, kind: input, shape index: {}]   ;;  %s5901_s19 = inlined_call_operand.vmem [shape: f32[1,32], index: 19, kind: input, shape index: {}]   ;;  %s5902_s20 = inlined_call_operand.vmem [shape: bf16[32,128], index: 20, kind: input, shape index: {}]   ;;  %s5903_s21 = inlined_call_operand.vmem [shape: f32[1,128], index: 21, kind: input, shape index: {}]   ;;  %s5904_s22 = inlined_call_operand.hbm [shape: f32[2,1,128], index: 22, kind: output, shape index: {}]  }
   0x1   :  { %5917 = sst [smem:[#allocation11_spill]] %s5882_s0 }
   0x2   :  { %5918 = sst [smem:[#allocation12_spill]] %s5883_s1 }
   0x3   :  { %5919 = sst [smem:[#allocation13_spill]] %s5884_s2 }
   0x4   :  { %5920 = sst [smem:[#allocation14_spill]] %s5885_s3 }
   0x5   :  { %5921 = sst [smem:[#allocation15_spill]] %s5886_s4 }
   0x6   :  { %5922 = sst [smem:[#allocation16_spill]] %s5887_s5 }
   0x7   :  { %5923 = sst [smem:[#allocation17_spill]] %s5888_s6 }
   0x8   :  { %5924 = sst [smem:[#allocation18_spill]] %s5904_s22 }
   0x9   :  { %27 = vsyncpa [#allocation3], 0 }
   0xa   :  { %29 = vsyncpa [#allocation3 + $0x1], 0  ;;  %s5098_s3 = smov 0   ;;  %s5100_s28 = smov 0  }
   0xb   :  { %s5102_s29 = smov 0   ;;  %s5104_s30 = smov 0  }
   0xc LB: > { %5925 = sst [smem:[#allocation5_spill]] %s4956_s3  ;;  %s5119_s4 = sadd.s32 4294967295, %s4968_s30   ;;  %s4968_s30 = sphi %s5104_s30, %s5948_s30   ;;  %s4964_s29 = sphi %s5102_s29, %s5950_s29   ;;  %s4960_s28 = sphi %s5100_s28, %s5952_s28   ;;  %s4956_s3 = sphi %s5098_s3, %s5951_s3  }
   0xd   : > { %5926 = sst [smem:[#allocation6_spill]] %s4964_s29  ;;  %s4244_s0 = sadd.s32 4294967294, %s4968_s30  }
   0xe   : > { %5927 = sst [smem:[#allocation7_spill]] %s4968_s30  ;;  %s5123_s23 = sadd.s32 1, %s4968_s30  }
   0xf   : > { %5928 = sst [smem:[#allocation8_spill]] %s5123_s23  ;;  %s514_s1 = sadd.s32 1, %s4964_s29 }
  0x10   : > { %s511_s5 = ssub.s32 %s4968_s30, %s5123_s23  ;;  %p524_p0 = scmp.ne.s32.totalorder %s4964_s29, %s4960_s28 }
  0x11   : > { %p512_p1 = scmp.eq.s32.totalorder %s511_s5, 0  ;;  %p525_p2 = scmp.eq.s32.totalorder %s5119_s4, 1 }
  0x12   : > { %p530_p3 = scmp.ne.s32.totalorder %s4960_s28, %s4956_s3  ;;  %p531_p4 = scmp.eq.s32.totalorder %s4244_s0, 1 }
  0x13   : > { %s5134_s24 = scalar_select %p512_p1, %s4964_s29, %s514_s1  }
  0x14   : > { %p5136_p5 = por %p525_p2, %p524_p0  ;;  %p5140_p6 = por %p531_p4, %p530_p3 }
  0x15   : > { %5929 = sst [smem:[#allocation9_spill]] %s5134_s24  ;;  %p4247_p7 = scmp.ge.s32.totalorder %s4968_s30, 1 }
  0x16   : > { %s5931_s25 = scalar_select %p5140_p6, 1, 0 }
  0x17   : > { %p622_p8 = scmp.lt.s32.totalorder %s4968_s30, 3 }
  0x18   : > { %5932 = sst [smem:[#allocation10_spill]] %s5931_s25 }
  0x19   : > { %p623_p9 = pnand %p4247_p7, %p622_p8 }
  0x1a   : > { %p685_p10 = scmp.lt.s32.totalorder (!%p623_p9), %s5119_s4, 1  ;;  %s5933_s27 = sld [smem:[#allocation13_spill]] (!%p623_p9)  ;;  %v4970_v1 = vmov (!%p623_p9), 0   ;;  %v4971_v2 = vmov (!%p623_p9), 0.0   ;;  %v694_v4 = vlaneseq (!%p623_p9)  ;;  %vm4972_vm1 = vmmov (!%p623_p9), 0  }
  0x1b   : > { %626 = sbr.rel (%p623_p9) target bundleno = 6384 (0x18f0), region = 108  ;;  %4811 = vset.pattern.permute.xlu0 (!%p623_p9), %v4970_v1  ;;  %4508 = vmatprep.subr.bf16.mxu0 (!%p623_p9), %v4971_v2  ;;  %s5934_s2 = sld [smem:[#allocation12_spill]] (!%p623_p9)  ;;  %v4973_v19 = vmov (!%p623_p9), 1.0|1.0   ;;  %vm810_vm4 = vcmask (!%p623_p9), 261120   ;;  %vm1545_vm5 = vcmask (!%p623_p9), 64512  }
  0x1c   : > { %4528 = vmatprep.subr.bf16.mxu1 (!%p623_p9), %v4971_v2  ;;  %s5935_s30 = sld [smem:[#allocation11_spill]] (!%p623_p9)  ;;  %v5167_v8 = vshrl.u32 (!%p623_p9), %v694_v4, 7  ;;  %4524 = vmatprep.mubr.msk.bf16.mxu0 (!%p623_p9), %vm4972_vm1, %v4971_v2  ;;  %v695_v17 = vand.u32 (!%p623_p9), 127, %v694_v4  ;;  %s5936_s3 = sld [smem:[#allocation14_spill]] (!%p623_p9)  ;;  %v4262_v48 = vld [vmem:[%s5889_s7] ss:$0 sm:$0xff] (!%p623_p9) }
  0x1d   : > { %4532 = vmatprep.mubr.msk.bf16.mxu1 (!%p623_p9), %vm4972_vm1, %v4971_v2  ;;  %v4271_v55 = vld [vmem:[%s5889_s7 + $0x1] ss:$0 sm:$0xff] (!%p623_p9)  ;;  %v4977_v4 = vmov (!%p623_p9), 1983009808   ;;  %vm1791_vm7 = vcmask (!%p623_p9), 1043456   ;;  %s5916_s29 = smov (!%p623_p9), 16  }
  0x1e   : > { %v1733_v10 = vsub.s32 (!%p623_p9), 0, %v5167_v8  ;;  %s5914_s25 = smov (!%p623_p9), 24   ;;  %vm2122_vm8 = vcmask (!%p623_p9), 130048   ;;  %vm2124_vm9 = vcmask (!%p623_p9), 195584   ;;  %s5941_s26 = smov (!%p623_p9), 16  }
  0x1f   : > { %s5943_s1 = smov (!%p623_p9), 24   ;;  %s683_s5 = sand.u32 (!%p623_p9), 1, %s4960_s28  }
  0x20   : > { %v4812_v0 = vld [vmem:[%s5933_s27] sm:$0xff] (!%p623_p9)   ;;  %v4813_v3 = vld [vmem:[%s5933_s27 + $0x8] sm:$0xff] (!%p623_p9)   ;;  %v4814_v7 = vld [vmem:[%s5933_s27 + $0x10] sm:$0xff] (!%p623_p9)  }
  0x21   : > { %4509 = vmatpush3.bf16.msra.mxu0 (!%p623_p9), %v4812_v0  ;;  %v4815_v11 = vld [vmem:[%s5933_s27 + $0x18] sm:$0xff] (!%p623_p9)   ;;  %v4816_v13 = vld [vmem:[%s5933_s27 + $0x20] sm:$0xff] (!%p623_p9)   ;;  %v4817_v14 = vld [vmem:[%s5933_s27 + $0x28] sm:$0xff] (!%p623_p9)  }
  0x22   : > { %s686_s0 = scalar_select %p685_p10, %s5119_s4, 1  ;;  %4510 = vmatprep.subr.bf16.mxu0 %v4971_v2  ;;  %v4818_v15 = vld [vmem:[%s5933_s27 + $0x30] sm:$0xff]   ;;  %v4819_v16 = vld [vmem:[%s5933_s27 + $0x38] sm:$0xff]   ;;  %v719_v20 = vld [vmem:[%s5936_s3] sm:$0xff] }
  0x23   : > { %s5940_s3 = sld [smem:[#allocation16_spill]] }
  0x24   : > { %s4248_s24 = sshll.u32 %s686_s0, 3  ;;  %s691_s23 = scalar_lea.vmem %s5934_s2, %s686_s0 }
  0x25   : > { %s688_s22 = scalar_lea.vmem %s5935_s30, %s4248_s24  ;;  %v839_v5 = vld [vmem:[%s691_s23] sm:$0x1]  ;;  %4511 = vmatpush3.bf16.msra.mxu0 %v4813_v3  ;;  %s5937_s30 = sld [smem:[#allocation17_spill]] }
  0x26   : > { %v693_v6 = vld [vmem:[%s688_s22] sm:$0xff]  ;;  %vm840_vm0 = vcmp.gt.f32.partialorder %v839_v5, 0.5  ;;  %4512 = vmatprep.subr.bf16.mxu0 %v4971_v2  ;;  %s5939_s2 = sld [smem:[#allocation15_spill]]  ;;  %s4976_s24 = smov 112   ;;  %v1047_v5 = vunpack.c.l.s4 %v4977_v4 }
  0x27   : > { %v1730_v9 = vsel %vm840_vm0, 1, %v4970_v1  ;;  %697 = vperm.xlu0 %4811, %v693_v6   ;;  %v4978_v6 = vmov 1934713408   ;;  %s5915_s22 = smov 8   ;;  %s4410_s0 = sshll.u32 %s5119_s4, 4 }
  0x28   : > { %v5175_v12 = vrot.slane %v1730_v9, %v1733_v10  ;;  %v1048_v9 = vunpack.c.0.s8 %v1047_v5 }
  0x29   : > { %4513 = vmatpush3.bf16.msra.mxu0 %v4814_v7  ;;  %v4261_v40 = vld [vmem:[%s5940_s3] ss:$0 sm:$0xff]  ;;  %s4974_s3 = smov 104   ;;  %v1064_v7 = vunpack.c.l.s4 %v4978_v6 }
  0x2a   : > { %4514 = vmatprep.subr.bf16.mxu0 %v4971_v2  ;;  %vm1735_vm6 = vcmp.eq.s32.totalorder %v5175_v12, 1 }
  0x2b   : > { %s5938_s23 = smov %s5937_s30  ;;  %v4820_v32 = vld [vmem:[%s5937_s30] sm:$0xff]   ;;  %s4975_s30 = smov 120  }
  0x2c   : > { %4529 = vmatpush3.bf16.msra.mxu1 %v4820_v32  ;;  %v4821_v33 = vld [vmem:[%s5938_s23 + $0x8] sm:$0xff]   ;;  %v4260_v38 = vld [vmem:[%s5939_s2] ss:$0 sm:$0xff]  ;;  %v4822_v43 = vld [vmem:[%s5938_s23 + $0x10] sm:$0xff]   ;;  %s5942_s2 = smov 8  }
  0x2d   : > { %4515 = vmatpush3.bf16.msra.mxu0 %v4815_v11  ;;  %4530 = vmatprep.subr.bf16.mxu1 %v4971_v2  ;;  %v4823_v45 = vld [vmem:[%s5938_s23 + $0x18] sm:$0xff]   ;;  %v4824_v46 = vld [vmem:[%s5938_s23 + $0x20] sm:$0xff]   ;;  %v4825_v47 = vld [vmem:[%s5938_s23 + $0x28] sm:$0xff]   ;;  %v1065_v11 = vunpack.c.0.s8 %v1064_v7 }
  0x2e   : > { %4516 = vmatprep.subr.bf16.mxu0 %v4971_v2 }
  0x30   : > { %4531 = vmatpush3.bf16.msra.mxu1 %v4821_v33 }
  0x31   : > { %4517 = vmatpush3.bf16.msra.mxu0 %v4816_v13  ;;  %4536 = vmatprep.subr.bf16.mxu1 %v4971_v2  ;;  %v5269_v13 = vsub.s32 %v1048_v9, %v5167_v8 }
  0x32   : > { %4518 = vmatprep.subr.bf16.mxu0 %v4971_v2 }
  0x35   : > { %4519 = vmatpush3.bf16.msra.mxu0 %v4817_v14 }
  0x36   : > { %4520 = vmatprep.subr.bf16.mxu0 %v4971_v2 }
  0x39   : > { %4521 = vmatpush3.bf16.msra.mxu0 %v4818_v15  ;;  %v5272_v15 = vsub.s32 %v1065_v11, %v5167_v8 }
  0x3a   : > { %4522 = vmatprep.subr.bf16.mxu0 %v4971_v2 }
  0x3d   : > { %4523 = vmatpush3.bf16.msra.mxu0 %v4819_v16 }
  0x3e   : > { %4570 = vmatprep.subr.bf16.mxu0 %v4971_v2 }
  0xa6   : > { %v698_v18 = vpop.permute.xlu0 %697 }
  0xa7   : > { %vm699_vm2 = vcmp.eq.s32.totalorder %v695_v17, %v698_v18 }
  0xa8   : > { %vm4258_vm3 = vmpackc.low %vm699_vm2, %vm699_vm2 }
  0xa9   : > { %4525 = vmatmul.mubr.msk.bf16.vlgmr.msra.gmra.mrb[0].mxu0 %vm4258_vm3, %v4973_v19 }
  0xaa   : > { %4572 = vmatprep.mubr.msk.bf16.mxu0 %vm4972_vm1, %v4971_v2 }
 0x17c   : > { %v802_v21 = vpop.f32.mrb[0].mxu0 }
 0x17d   : > { %v803_v22 = vadd.f32 %v802_v21, %v719_v20  ;;  %v4526_v23 = vpop.f32.mrb[1].mxu0 }
 0x17e   : > { %v805_v24 = vpop.f32.mrb[2].mxu0 }
 0x17f   : > { %v4527_v25 = vpop.f32.mrb[3].mxu0  ;;  %v811_v26 = vsel %vm810_vm4, %v803_v22, 0.0 }
 0x180   : > { %812 = vadd.xlane.f32.xlu0 %v811_v26 }
 0x20d   : > { %v813_v27 = vpop.xlane.xlu0 %812 }
 0x20e   : > { %v815_v28 = vmul.f32 0.03125, %v813_v27 }
 0x210   : > { %v816_v29 = vsub.f32 %v803_v22, %v815_v28 }
 0x212   : > { %v817_v30 = vmul.f32 %v816_v29, %v816_v29 }
 0x214   : > { %v818_v31 = vsel %vm810_vm4, %v817_v30, 0.0 }
 0x215   : > { %819 = vadd.xlane.f32.xlu1 %v818_v31 }
 0x2a2   : > { %v820_v34 = vpop.xlane.xlu1 %819 }
 0x2a3   : > { %v821_v35 = vmul.f32 0.03125, %v820_v34 }
 0x2a5   : > { %v822_v36 = vadd.f32 1e-12, %v821_v35 }
 0x2a7   : > { %4860 = vrsqrt.f32 %v822_v36 }
 0x2b1   : > { %v4861_v37 = vpop.eup %4860 }
 0x2b2   : > { %v824_v39 = vmul.f32 %v4861_v37, %v816_v29 }
 0x2b4   : > { %v831_v41 = vmul.f32 %v4260_v38, %v824_v39 }
 0x2b6   : > { %v5220_v42 = vadd.f32 %v4261_v40, %v831_v41 }
 0x2b8   : > { %v841_v44 = vpack.c.bf16 %v5220_v42, %v5220_v42 }
 0x2ba   : > { %4533 = vmatmul.mubr.msk.bf16.vlgmr.msra.gmra.mrb[0].mxu1 %vm810_vm4, %v841_v44 }
 0x2bb   : > { %4537 = vmatpush3.bf16.msra.mxu1 %v4822_v43  ;;  %4540 = vmatprep.mubr.msk.bf16.mxu1 %vm4972_vm1, %v4971_v2 }
 0x2bc   : > { %4538 = vmatprep.subr.bf16.mxu1 %v4971_v2 }
 0x2bf   : > { %4539 = vmatpush3.bf16.msra.mxu1 %v4823_v45 }
 0x2c0   : > { %4544 = vmatprep.subr.bf16.mxu1 %v4971_v2 }
 0x2c2   : > { %4541 = vmatmul.mubr.msk.bf16.vlgmr.msra.gmra.mrb[4].mxu1 %vm810_vm4, %v841_v44 }
 0x2c3   : > { %4545 = vmatpush3.bf16.msra.mxu1 %v4824_v46  ;;  %4548 = vmatprep.mubr.msk.bf16.mxu1 %vm4972_vm1, %v4971_v2 }
 0x2c4   : > { %4546 = vmatprep.subr.bf16.mxu1 %v4971_v2 }
 0x2c7   : > { %4547 = vmatpush3.bf16.msra.mxu1 %v4825_v47 }
 0x2c8   : > { %4552 = vmatprep.subr.bf16.mxu1 %v4971_v2 }
 0x2ca   : > { %4549 = vmatmul.mubr.msk.bf16.vlgmr.msra.gmra.mrb[8].mxu1 %vm810_vm4, %v841_v44 }
 0x2cb   : > { %4554 = vmatprep.mubr.msk.bf16.mxu1 %vm4972_vm1, %v4971_v2 }
 0x38d   : > { %v902_v49 = vpop.f32.mrb[0].mxu1 }
 0x38e   : > { %v903_v50 = vadd.f32 %v4262_v48, %v902_v49  ;;  %v4534_v51 = vpop.f32.mrb[1].mxu1 }
 0x38f   : > { %v905_v52 = vpop.f32.mrb[2].mxu1 }
 0x390   : > { %v5252_v53 = vpack.c.bf16 %v903_v50, %v903_v50  ;;  %v4535_v54 = vpop.f32.mrb[3].mxu1 }
 0x392   : > { %1044 = vrot.lane.b32.xlu0 %v5252_v53, %s4974_s3 }
 0x395   : > { %v967_v56 = vpop.f32.mrb[4].mxu1 }
 0x396   : > { %v968_v57 = vadd.f32 %v4271_v55, %v967_v56  ;;  %v4542_v58 = vpop.f32.mrb[5].mxu1 }
 0x397   : > { %v970_v59 = vpop.f32.mrb[6].mxu1 }
 0x398   : > { %v1207_v60 = vpack.c.bf16 %v968_v57, %v968_v57  ;;  %v4543_v61 = vpop.f32.mrb[7].mxu1 }
 0x39a   : > { %1209 = vrot.lane.b32.xlu1 %v1207_v60, %s4975_s30  ;;  %v1221_v16 = vrot.slane %v1207_v60, %v5269_v13 }
 0x39d   : > { %v5260_v62 = vpop.f32.mrb[8].mxu1 }
 0x39e   : > { %1211 = vrot.lane.b32.xlu1 %v1207_v60, %s4976_s24  ;;  %v4550_v63 = vpop.f32.mrb[9].mxu1 }
 0x39f   : > { %v1035_v0 = vpop.f32.mrb[10].mxu1 }
 0x3a0   : > { %v4551_v3 = vpop.f32.mrb[11].mxu1  ;;  %v1052_v0 = vrot.slane %v5252_v53, %v5269_v13 }
 0x3a2   : > { %1213 = vrot.lane.b32.xlu1 %v1207_v60, %s4974_s3 }
 0x3a6   : > { %1040 = vrot.lane.b32.xlu1 %v5252_v53, %s4975_s30 }
 0x3aa   : > { %1042 = vrot.lane.b32.xlu1 %v5252_v53, %s4976_s24 }
 0x404   : > { %v1045_v24 = vpop.permute.xlu0 %1044 }
 0x405   : > { %v1094_v29 = vrot.slane %v1045_v24, %v5269_v13 }
 0x40c   : > { %v1210_v10 = vpop.permute.xlu1 %1209 }
 0x40d   : > { %v1255_v25 = vrot.slane %v1210_v10, %v5269_v13 }
 0x410   : > { %v1212_v14 = vpop.permute.xlu1 %1211 }
 0x411   : > { %v1229_v17 = vrot.slane %v1212_v14, %v5269_v13 }
 0x413   : > { %v1230_v18 = vcombine.low %v1221_v16, %v1229_v17  ;;  %v1231_v19 = vcombine.high %v1221_v16, %v1229_v17 }
 0x414   : > { %v1214_v20 = vpop.permute.xlu1 %1213 }
 0x415   : > { %v1238_v21 = vrot.slane %v1230_v18, %v5272_v15  ;;  %v1245_v22 = vrot.slane %v1231_v19, %v5272_v15  ;;  %v1263_v23 = vrot.slane %v1214_v20, %v5269_v13 }
 0x417   : > { %v1246_v26 = vcombine.high %v1238_v21, %v4970_v1  ;;  %v1264_v8 = vcombine.low %v1255_v25, %v1263_v23  ;;  %v1265_v27 = vcombine.high %v1255_v25, %v1263_v23  ;;  %v1247_v30 = vcombine.high %v1245_v22, %v4970_v1 }
 0x418   : > { %v1041_v28 = vpop.permute.xlu1 %1040  ;;  %v1286_v32 = vshrl.u32 %v1238_v21, 16  ;;  %v1302_v36 = vshrl.u32 %v1245_v22, 16 }
 0x419   : > { %v1086_v31 = vrot.slane %v1041_v28, %v5269_v13  ;;  %v1272_v33 = vrot.slane %v1264_v8, %v5272_v15  ;;  %v1279_v34 = vrot.slane %v1265_v27, %v5272_v15  ;;  %v1294_v35 = vshrl.u32 %v1246_v26, 16 }
 0x41a   : > { %v1310_v44 = vshrl.u32 %v1247_v30, 16 }
 0x41b   : > { %v1095_v37 = vcombine.low %v1086_v31, %v1094_v29  ;;  %v1096_v38 = vcombine.high %v1086_v31, %v1094_v29  ;;  %v1280_v39 = vcombine.high %v1272_v33, %v4970_v1  ;;  %v1281_v40 = vcombine.high %v1279_v34, %v4970_v1 }
 0x41c   : > { %v1284_v41 = vpack.i.b16 %v1272_v33, %v1238_v21  ;;  %v1287_v43 = vshrl.u32 %v1272_v33, 16  ;;  %v1300_v45 = vpack.i.b16 %v1279_v34, %v1245_v22  ;;  %v1303_v46 = vshrl.u32 %v1279_v34, 16  ;;  %v1043_v57 = vpop.permute.xlu1 %1042 }
 0x41d   : > { %v1103_v47 = vrot.slane %v1095_v37, %v5272_v15  ;;  %v1292_v49 = vpack.i.b16 %v1280_v39, %v1246_v26  ;;  %v1295_v50 = vshrl.u32 %v1280_v39, 16  ;;  %v1308_v51 = vpack.i.b16 %v1281_v40, %v1247_v30 }
 0x41e   : > { %v1288_v48 = vpack.i.b16 %v1287_v43, %v1286_v32  ;;  %v1304_v52 = vpack.i.b16 %v1303_v46, %v1302_v36  ;;  %v1311_v54 = vshrl.u32 %v1281_v40, 16  ;;  %v1314_v55 = vcombine.low %v1284_v41, %v1300_v45 }
 0x41f   : > { %v1110_v56 = vrot.slane %v1096_v38, %v5272_v15  ;;  %v1296_v58 = vpack.i.b16 %v1295_v50, %v1294_v35  ;;  %v1322_v59 = vcombine.low %v1292_v49, %v1308_v51  ;;  %v1060_v3 = vrot.slane %v1043_v57, %v5269_v13 }
 0x420   : > { %v1312_v60 = vpack.i.b16 %v1311_v54, %v1310_v44  ;;  %v1339_v61 = vcombine.low %v1288_v48, %v1304_v52  ;;  %v1321_v63 = vrot.slane %v1314_v55, %v5269_v13  ;;  %v1111_v6 = vcombine.high %v1103_v47, %v4970_v1 }
 0x421   : > { %v1329_v4 = vrot.slane %v1322_v59, %v5269_v13  ;;  %v1112_v7 = vcombine.high %v1110_v56, %v4970_v1  ;;  %v1061_v9 = vcombine.low %v1052_v0, %v1060_v3  ;;  %v1062_v10 = vcombine.high %v1052_v0, %v1060_v3 }
 0x422   : > { %v1347_v5 = vcombine.low %v1296_v58, %v1312_v60  ;;  %v1346_v14 = vrot.slane %v1339_v61, %v5269_v13  ;;  %v1118_v17 = vshrl.u32 %v1103_v47, 16  ;;  %v1126_v20 = vshrl.u32 %v1111_v6, 16 }
 0x423   : > { %v1330_v11 = vcombine.low %v1321_v63, %v1329_v4  ;;  %v1069_v53 = vrot.slane %v1061_v9, %v5272_v15  ;;  %v1076_v18 = vrot.slane %v1062_v10, %v5272_v15  ;;  %v1134_v21 = vshrl.u32 %v1110_v56, 16 }
 0x424   : > { %v1354_v16 = vrot.slane %v1347_v5, %v5269_v13  ;;  %v1142_v22 = vshrl.u32 %v1112_v7, 16 }
 0x425   : > { %v1337_v19 = vrot.slane %v1330_v11, %v5272_v15  ;;  %v1077_v24 = vcombine.high %v1069_v53, %v4970_v1  ;;  %v1078_v25 = vcombine.high %v1076_v18, %v4970_v1  ;;  %v1115_v26 = vpack.i.b16 %v1103_v47, %v1069_v53 }
 0x426   : > { %v1355_v23 = vcombine.low %v1346_v14, %v1354_v16  ;;  %v1117_v8 = vshrl.u32 %v1069_v53, 16  ;;  %v1131_v27 = vpack.i.b16 %v1110_v56, %v1076_v18  ;;  %v1133_v28 = vshrl.u32 %v1076_v18, 16 }
 0x427   : > { %v1338_v30 = vcombine.high %v1337_v19, %v4970_v1  ;;  %v1123_v32 = vpack.i.b16 %v1111_v6, %v1077_v24  ;;  %v1125_v33 = vshrl.u32 %v1077_v24, 16  ;;  %v1139_v34 = vpack.i.b16 %v1112_v7, %v1078_v25 }
 0x428   : > { %v1362_v29 = vrot.slane %v1355_v23, %v5272_v15  ;;  %v1119_v31 = vpack.i.b16 %v1118_v17, %v1117_v8  ;;  %v1135_v35 = vpack.i.b16 %v1134_v21, %v1133_v28  ;;  %v1141_v36 = vshrl.u32 %v1078_v25, 16 }
 0x429   : > { %v1145_v37 = vcombine.low %v1115_v26, %v1131_v27  ;;  %v1127_v39 = vpack.i.b16 %v1126_v20, %v1125_v33  ;;  %v1153_v40 = vcombine.low %v1123_v32, %v1139_v34  ;;  %v1373_v48 = vshrl.u32 %v1338_v30, 16 }
 0x42a   : > { %v1366_v38 = vpack.i.b16 %v1362_v29, %v1337_v19  ;;  %v1363_v41 = vcombine.high %v1362_v29, %v4970_v1  ;;  %v1143_v43 = vpack.i.b16 %v1142_v22, %v1141_v36  ;;  %v1170_v44 = vcombine.low %v1119_v31, %v1135_v35 }
 0x42b   : > { %v1152_v46 = vrot.slane %v1145_v37, %v5269_v13  ;;  %v1160_v47 = vrot.slane %v1153_v40, %v5269_v13  ;;  %v1368_v56 = vshrl.u32 %v1362_v29, 16  ;;  %v1367_v60 = vshrl.u32 %v1337_v19, 16 }
 0x42c   : > { %v1550_v45 = vsel %vm1545_vm5, %v1366_v38, 0  ;;  %v1374_v49 = vshrl.u32 %v1363_v41, 16  ;;  %v1178_v50 = vcombine.low %v1127_v39, %v1143_v43  ;;  %v1177_v54 = vrot.slane %v1170_v44, %v5269_v13 }
 0x42d   : > { %4553 = vmatpush3.bf16.xpose.msra.mxu1 %v1550_v45  ;;  %v1161_v51 = vcombine.low %v1152_v46, %v1160_v47  ;;  %v1369_v63 = vpack.i.b16 %v1368_v56, %v1367_v60  ;;  %v1372_v14 = vpack.i.b16 %v1363_v41, %v1338_v30  ;;  %v4280_v41 = vld [vmem:[%s5889_s7 + $0x2] ss:$0 sm:$0xff] }
 0x42e   : > { %4558 = vmatprep.subr.bf16.mxu1 %v4971_v2  ;;  %v1375_v52 = vpack.i.b16 %v1374_v49, %v1373_v48  ;;  %v1185_v55 = vrot.slane %v1178_v50, %v5269_v13  ;;  %v1033_v43 = vadd.f32 %v4280_v41, %v5260_v62 }
 0x42f   : > { %v1168_v58 = vrot.slane %v1161_v51, %v5272_v15  ;;  %v1596_v5 = vsel %vm1545_vm5, %v1369_v63, 0  ;;  %v1642_v17 = vsel %vm1545_vm5, %v1372_v14, 0 }
 0x430   : > { %v1688_v57 = vsel %vm1545_vm5, %v1375_v52, 0  ;;  %v1186_v59 = vcombine.low %v1177_v54, %v1185_v55  ;;  %v1376_v44 = vpack.c.bf16 %v1033_v43, %v1033_v43 }
 0x431   : > { %4571 = vmatpush3.bf16.xpose.msra.mxu0 %v1688_v57  ;;  %v1169_v0 = vcombine.high %v1168_v58, %v4970_v1  ;;  %v1198_v11 = vshrl.u32 %v1168_v58, 16 }
 0x432   : > { %4582 = vmatprep.subr.bf16.mxu0 %v4971_v2  ;;  %v1193_v61 = vrot.slane %v1186_v59, %v5272_v15 }
 0x433   : > { %v1204_v6 = vshrl.u32 %v1169_v0, 16 }
 0x434   : > { %v1197_v3 = vpack.i.b16 %v1193_v61, %v1168_v58  ;;  %v1194_v4 = vcombine.high %v1193_v61, %v4970_v1  ;;  %v1199_v10 = vshrl.u32 %v1193_v61, 16 }
 0x436   : > { %4555 = vmatmul.mubr.msk.bf16.vlgmr.msra.gmra.mrb[12].mxu1 %vm1545_vm5, %v1197_v3  ;;  %v1205_v7 = vshrl.u32 %v1194_v4, 16  ;;  %v1200_v16 = vpack.i.b16 %v1199_v10, %v1198_v11  ;;  %v1203_v53 = vpack.i.b16 %v1194_v4, %v1169_v0 }
 0x437   : > { %4559 = vmatpush3.bf16.xpose.msra.mxu1 %v1596_v5  ;;  %4560 = vmatprep.mubr.msk.bf16.mxu1 %vm4972_vm1, %v4971_v2 }
 0x438   : > { %v1206_v9 = vpack.i.b16 %v1205_v7, %v1204_v6  ;;  %4564 = vmatprep.subr.bf16.mxu1 %v4971_v2  ;;  %v1390_v6 = vrot.slane %v1376_v44, %v5269_v13 }
 0x43a   : > { %4573 = vmatmul.mubr.msk.bf16.vlgmr.msra.gmra.mrb[4].mxu0 %vm1545_vm5, %v1206_v9 }
 0x43b   : > { %4584 = vmatprep.mubr.msk.bf16.mxu0 %vm4972_vm1, %v4971_v2 }
 0x43e   : > { %4561 = vmatmul.mubr.msk.bf16.vlgmr.msra.gmra.mrb[16].mxu1 %vm1545_vm5, %v1200_v16 }
 0x43f   : > { %4565 = vmatpush3.bf16.xpose.msra.mxu1 %v1642_v17  ;;  %4566 = vmatprep.mubr.msk.bf16.mxu1 %vm4972_vm1, %v4971_v2 }
 0x440   : > { %4576 = vmatprep.subr.bf16.mxu1 %v4971_v2 }
 0x446   : > { %4567 = vmatmul.mubr.msk.bf16.vlgmr.msra.gmra.mrb[20].mxu1 %vm1545_vm5, %v1203_v53 }
 0x447   : > { %4578 = vmatprep.mubr.msk.bf16.mxu1 %vm4972_vm1, %v4971_v2 }
 0x509   : > { %v1586_v18 = vpop.f32.mrb[12].mxu1 }
 0x50a   : > { %v1736_v19 = vsel %vm1735_vm6, %v1586_v18, -3.4028235e+38  ;;  %v4556_v20 = vpop.f32.mrb[13].mxu1 }
 0x50b   : > { %v1589_v21 = vpop.f32.mrb[14].mxu1  ;;  %v1740_v22 = vsel %vm1545_vm5, %v1736_v19, -inf }
 0x50c   : > { %1741 = vmax.xlane.f32.xlu1 %v1740_v22  ;;  %v4557_v23 = vpop.f32.mrb[15].mxu1 }
 0x50d   : > { %v1724_v24 = vpop.f32.mrb[4].mxu0 }
 0x50e   : > { %v1739_v25 = vsel %vm1735_vm6, %v1724_v24, -3.4028235e+38  ;;  %v4574_v26 = vpop.f32.mrb[5].mxu0 }
 0x50f   : > { %v1727_v8 = vpop.f32.mrb[6].mxu0  ;;  %v1749_v27 = vsel %vm1545_vm5, %v1739_v25, -inf }
 0x510   : > { %1750 = vmax.xlane.f32.xlu1 %v1749_v27  ;;  %v4575_v28 = vpop.f32.mrb[7].mxu0 }
 0x511   : > { %v1632_v29 = vpop.f32.mrb[16].mxu1 }
 0x512   : > { %v1737_v30 = vsel %vm1735_vm6, %v1632_v29, -3.4028235e+38  ;;  %v4562_v31 = vpop.f32.mrb[17].mxu1 }
 0x513   : > { %v1635_v32 = vpop.f32.mrb[18].mxu1  ;;  %v1743_v33 = vsel %vm1545_vm5, %v1737_v30, -inf }
 0x514   : > { %1744 = vmax.xlane.f32.xlu0 %v1743_v33  ;;  %v4563_v34 = vpop.f32.mrb[19].mxu1 }
 0x519   : > { %v1678_v35 = vpop.f32.mrb[20].mxu1 }
 0x51a   : > { %v1738_v36 = vsel %vm1735_vm6, %v1678_v35, -3.4028235e+38  ;;  %v4568_v37 = vpop.f32.mrb[21].mxu1 }
 0x51b   : > { %v1681_v38 = vpop.f32.mrb[22].mxu1  ;;  %v1746_v39 = vsel %vm1545_vm5, %v1738_v36, -inf }
 0x51c   : > { %v4569_v40 = vpop.f32.mrb[23].mxu1  ;;  %1747 = vmax.xlane.f32.xlu1 %v1746_v39 }
 0x52a   : > { %1378 = vrot.lane.b32.xlu0 %v1376_v44, %s4975_s30 }
 0x52d   : > { %1380 = vrot.lane.b32.xlu1 %v1376_v44, %s4976_s24 }
 0x599   : > { %v1742_v45 = vpop.xlane.xlu1 %1741 }
 0x59a   : > { %v1752_v46 = vsub.f32 %v1736_v19, %v1742_v45 }
 0x59c   : > { %v1756_v47 = vmul.f32 1.442695, %v1752_v46 }
 0x59d   : > { %v1751_v51 = vpop.xlane.xlu1 %1750 }
 0x59e   : > { %4862 = vpow2.f32 %v1756_v47  ;;  %v1755_v61 = vsub.f32 %v1739_v25, %v1751_v51 }
 0x5a0   : > { %v1762_v63 = vmul.f32 1.442695, %v1755_v61 }
 0x5a1   : > { %v1745_v48 = vpop.xlane.xlu0 %1744 }
 0x5a2   : > { %v1753_v49 = vsub.f32 %v1737_v30, %v1745_v48 }
 0x5a4   : > { %v1758_v50 = vmul.f32 1.442695, %v1753_v49 }
 0x5a5   : > { %v1379_v14 = vpop.permute.xlu0 %1378 }
 0x5a6   : > { %4864 = vpow2.f32 %v1758_v50  ;;  %v1424_v18 = vrot.slane %v1379_v14, %v5269_v13 }
 0x5a8   : > { %v5354_v52 = vpop.eup %4862 }
 0x5a9   : > { %v1748_v54 = vpop.xlane.xlu1 %1747  ;;  %v1764_v62 = vsel %vm1545_vm5, %v5354_v52, 0.0 }
 0x5aa   : > { %v1754_v55 = vsub.f32 %v1738_v36, %v1748_v54  ;;  %1765 = vadd.xlane.f32.xlu1 %v1764_v62 }
 0x5ac   : > { %v1760_v56 = vmul.f32 1.442695, %v1754_v55 }
 0x5ad   : > { %v1381_v4 = vpop.permute.xlu1 %1380 }
 0x5ae   : > { %4866 = vpow2.f32 %v1760_v56  ;;  %v1398_v5 = vrot.slane %v1381_v4, %v5269_v13 }
 0x5af   : > { %4868 = vpow2.f32 %v1762_v63 }
 0x5b0   : > { %v5358_v57 = vpop.eup %4864  ;;  %v1399_v9 = vcombine.low %v1390_v6, %v1398_v5  ;;  %v1400_v10 = vcombine.high %v1390_v6, %v1398_v5 }
 0x5b1   : > { %v1767_v58 = vsel %vm1545_vm5, %v5358_v57, 0.0 }
 0x5b2   : > { %1768 = vadd.xlane.f32.xlu1 %v1767_v58  ;;  %v1407_v16 = vrot.slane %v1399_v9, %v5272_v15  ;;  %v1414_v17 = vrot.slane %v1400_v10, %v5272_v15 }
 0x5b4   : > { %v1415_v20 = vcombine.high %v1407_v16, %v4970_v1  ;;  %v1416_v23 = vcombine.high %v1414_v17, %v4970_v1  ;;  %v1455_v26 = vshrl.u32 %v1407_v16, 16  ;;  %v1471_v27 = vshrl.u32 %v1414_v17, 16 }
 0x5b6   : > { %v1463_v8 = vshrl.u32 %v1415_v20, 16  ;;  %v1479_v32 = vshrl.u32 %v1416_v23, 16 }
 0x5b8   : > { %v5362_v59 = vpop.eup %4866 }
 0x5b9   : > { %v1770_v60 = vsel %vm1545_vm5, %v5362_v59, 0.0  ;;  %v5367_v0 = vpop.eup %4868 }
 0x5ba   : > { %1771 = vadd.xlane.f32.xlu0 %v1770_v60  ;;  %v1773_v3 = vsel %vm1545_vm5, %v5367_v0, 0.0 }
 0x5c3   : > { %1382 = vrot.lane.b32.xlu1 %v1376_v44, %s4974_s3 }
 0x5e7   : > { %1774 = vadd.xlane.f32.xlu1 %v1773_v3 }
 0x637   : > { %v1766_v7 = vpop.xlane.xlu1 %1765 }
 0x638   : > { %4870 = vrcp.f32 %v1766_v7 }
 0x63f   : > { %v1769_v11 = vpop.xlane.xlu1 %1768 }
 0x640   : > { %4872 = vrcp.f32 %v1769_v11 }
 0x642   : > { %v4871_v56 = vpop.eup %4870 }
 0x643   : > { %v1383_v53 = vpop.permute.xlu1 %1382  ;;  %v1780_v3 = vmul.f32 %v4871_v56, %v5354_v52 }
 0x644   : > { %v1432_v19 = vrot.slane %v1383_v53, %v5269_v13 }
 0x646   : > { %v1433_v21 = vcombine.low %v1424_v18, %v1432_v19  ;;  %v1434_v22 = vcombine.high %v1424_v18, %v1432_v19  ;;  %v1784_v18 = vpack.c.bf16 %v1780_v3, %v1780_v3 }
 0x647   : > { %v1772_v50 = vpop.xlane.xlu0 %1771 }
 0x648   : > { %v1441_v24 = vrot.slane %v1433_v21, %v5272_v15  ;;  %v1448_v25 = vrot.slane %v1434_v22, %v5272_v15  ;;  %4874 = vrcp.f32 %v1772_v50 }
 0x64a   : > { %v1449_v28 = vcombine.high %v1441_v24, %v4970_v1  ;;  %v1450_v29 = vcombine.high %v1448_v25, %v4970_v1  ;;  %v1453_v30 = vpack.i.b16 %v1441_v24, %v1407_v16  ;;  %v1456_v31 = vshrl.u32 %v1441_v24, 16  ;;  %v4873_v61 = vpop.eup %4872 }
 0x64b   : > { %v1469_v33 = vpack.i.b16 %v1448_v25, %v1414_v17  ;;  %v1472_v34 = vshrl.u32 %v1448_v25, 16  ;;  %v1781_v9 = vmul.f32 %v4873_v61, %v5358_v57 }
 0x64c   : > { %v1457_v35 = vpack.i.b16 %v1456_v31, %v1455_v26  ;;  %v1461_v36 = vpack.i.b16 %v1449_v28, %v1415_v20  ;;  %v1464_v37 = vshrl.u32 %v1449_v28, 16  ;;  %v1477_v38 = vpack.i.b16 %v1450_v29, %v1416_v23 }
 0x64d   : > { %v1473_v39 = vpack.i.b16 %v1472_v34, %v1471_v27  ;;  %v1480_v40 = vshrl.u32 %v1450_v29, 16  ;;  %v1483_v41 = vcombine.low %v1453_v30, %v1469_v33  ;;  %v1785_v57 = vpack.c.bf16 %v1781_v9, %v1781_v9 }
 0x64e   : > { %v1465_v43 = vpack.i.b16 %v1464_v37, %v1463_v8  ;;  %v1491_v44 = vcombine.low %v1461_v36, %v1477_v38 }
 0x64f   : > { %v1481_v45 = vpack.i.b16 %v1480_v40, %v1479_v32  ;;  %v1508_v46 = vcombine.low %v1457_v35, %v1473_v39  ;;  %v1490_v47 = vrot.slane %v1483_v41, %v5269_v13 }
 0x650   : > { %v1498_v48 = vrot.slane %v1491_v44, %v5269_v13 }
 0x651   : > { %v1516_v49 = vcombine.low %v1465_v43, %v1481_v45  ;;  %v1515_v54 = vrot.slane %v1508_v46, %v5269_v13 }
 0x652   : > { %v1499_v51 = vcombine.low %v1490_v47, %v1498_v48  ;;  %v4875_v19 = vpop.eup %4874 }
 0x653   : > { %v1523_v62 = vrot.slane %v1516_v49, %v5269_v13  ;;  %v1782_v21 = vmul.f32 %v4875_v19, %v5362_v59 }
 0x654   : > { %v1506_v55 = vrot.slane %v1499_v51, %v5272_v15 }
 0x655   : > { %v1524_v58 = vcombine.low %v1515_v54, %v1523_v62  ;;  %v1786_v23 = vpack.c.bf16 %v1782_v21, %v1782_v21 }
 0x656   : > { %v1507_v60 = vcombine.high %v1506_v55, %v4970_v1  ;;  %v1536_v5 = vshrl.u32 %v1506_v55, 16 }
 0x657   : > { %v1531_v63 = vrot.slane %v1524_v58, %v5272_v15 }
 0x658   : > { %v1542_v10 = vshrl.u32 %v1507_v60, 16 }
 0x659   : > { %v1535_v4 = vpack.i.b16 %v1531_v63, %v1506_v55  ;;  %v1537_v6 = vshrl.u32 %v1531_v63, 16  ;;  %v1532_v7 = vcombine.high %v1531_v63, %v4970_v1  ;;  %v4826_v55 = vld [vmem:[%s5890_s8] sm:$0xff]  }
 0x65b   : > { %v1793_v11 = vsel %vm1791_vm7, %v1535_v4, 0  ;;  %v1538_v14 = vpack.i.b16 %v1537_v6, %v1536_v5  ;;  %v1541_v16 = vpack.i.b16 %v1532_v7, %v1507_v60  ;;  %v1543_v17 = vshrl.u32 %v1532_v7, 16  ;;  %v4827_v6 = vld [vmem:[%s5890_s8 + $0x8] sm:$0xff]  }
 0x65c   : > { %4577 = vmatpush3.bf16.msra.mxu1 %v1793_v11 }
 0x65d   : > { %v1839_v53 = vsel %vm1791_vm7, %v1538_v14, 0  ;;  %4588 = vmatprep.subr.bf16.mxu1 %v4971_v2  ;;  %v1544_v52 = vpack.i.b16 %v1543_v17, %v1542_v10  ;;  %v1885_v20 = vsel %vm1791_vm7, %v1541_v16, 0 }
 0x65e   : > { %4583 = vmatpush3.bf16.msra.mxu0 %v1839_v53 }
 0x65f   : > { %4579 = vmatmul.mubr.msk.bf16.vlgmr.msra.gmra.mrb[24].mxu1 %vm1545_vm5, %v1784_v18  ;;  %4594 = vmatprep.subr.bf16.mxu0 %v4971_v2  ;;  %v1931_v22 = vsel %vm1791_vm7, %v1544_v52, 0 }
 0x660   : > { %4589 = vmatpush3.bf16.msra.mxu1 %v1885_v20  ;;  %4590 = vmatprep.mubr.msk.bf16.mxu1 %vm4972_vm1, %v4971_v2 }
 0x661   : > { %4585 = vmatmul.mubr.msk.bf16.vlgmr.msra.gmra.mrb[8].mxu0 %vm1545_vm5, %v1785_v57  ;;  %4600 = vmatprep.subr.bf16.mxu1 %v4971_v2 }
 0x662   : > { %4595 = vmatpush3.bf16.msra.mxu0 %v1931_v22  ;;  %4596 = vmatprep.mubr.msk.bf16.mxu0 %vm4972_vm1, %v4971_v2 }
 0x663   : > { %4608 = vmatprep.subr.bf16.mxu0 %v4971_v2 }
 0x667   : > { %4591 = vmatmul.mubr.msk.bf16.vlgmr.msra.gmra.mrb[28].mxu1 %vm1545_vm5, %v1786_v23 }
 0x668   : > { %4604 = vmatprep.mubr.msk.bf16.mxu1 %vm4972_vm1, %v4971_v2  ;;  %4601 = vmatpush3.bf16.msra.mxu1 %v4826_v55  ;;  %v4831_v55 = vld [vmem:[%s5896_s14 + $0x8] sm:$0xff]  }
 0x669   : > { %4602 = vmatprep.subr.bf16.mxu1 %v4971_v2 }
 0x66c   : > { %4603 = vmatpush3.bf16.msra.mxu1 %v4827_v6 }
 0x66d   : > { %4616 = vmatprep.subr.bf16.mxu1 %v4971_v2 }
 0x674   : > { %v1775_v24 = vpop.xlane.xlu1 %1774 }
 0x675   : > { %4876 = vrcp.f32 %v1775_v24 }
 0x67f   : > { %v4877_v59 = vpop.eup %4876 }
 0x680   : > { %v1783_v25 = vmul.f32 %v4877_v59, %v5367_v0 }
 0x682   : > { %v1787_v26 = vpack.c.bf16 %v1783_v25, %v1783_v25 }
 0x684   : > { %4597 = vmatmul.mubr.msk.bf16.vlgmr.msra.gmra.mrb[12].mxu0 %vm1545_vm5, %v1787_v26 }
 0x685   : > { %4612 = vmatprep.mubr.msk.bf16.mxu0 %vm4972_vm1, %v4971_v2 }
 0x732   : > { %v1829_v8 = vpop.f32.mrb[24].mxu1 }
 0x733   : > { %v4580_v27 = vpop.f32.mrb[25].mxu1 }
 0x734   : > { %v1832_v28 = vpop.f32.mrb[26].mxu1  ;;  %v1875_v29 = vpop.f32.mrb[8].mxu0 }
 0x735   : > { %v4581_v30 = vpop.f32.mrb[27].mxu1  ;;  %v4586_v31 = vpop.f32.mrb[9].mxu0 }
 0x736   : > { %v1878_v32 = vpop.f32.mrb[10].mxu0 }
 0x737   : > { %v4587_v33 = vpop.f32.mrb[11].mxu0 }
 0x73a   : > { %v1921_v34 = vpop.f32.mrb[28].mxu1 }
 0x73b   : > { %v1973_v35 = vcombine.low %v1829_v8, %v1921_v34  ;;  %v1974_v36 = vcombine.high %v1829_v8, %v1921_v34  ;;  %v4592_v37 = vpop.f32.mrb[29].mxu1 }
 0x73c   : > { %v1924_v38 = vpop.f32.mrb[30].mxu1 }
 0x73d   : > { %v4593_v0 = vpop.f32.mrb[31].mxu1  ;;  %v1981_v45 = vrot.slane %v1973_v35, %v5269_v13  ;;  %v1988_v46 = vrot.slane %v1974_v36, %v5269_v13 }
 0x757   : > { %v1967_v39 = vpop.f32.mrb[12].mxu0 }
 0x758   : > { %v1989_v40 = vcombine.low %v1875_v29, %v1967_v39  ;;  %v1990_v41 = vcombine.high %v1875_v29, %v1967_v39  ;;  %v4598_v43 = vpop.f32.mrb[13].mxu0  ;;  %v4294_v29 = vld [vmem:[%s5891_s9] ss:$0 sm:$0xff] }
 0x759   : > { %v1970_v44 = vpop.f32.mrb[14].mxu0  ;;  %v4829_v43 = vld [vmem:[%s5894_s12 + $0x8] sm:$0xff]  }
 0x75a   : > { %v1997_v47 = vrot.slane %v1989_v40, %v5269_v13  ;;  %v2004_v48 = vrot.slane %v1990_v41, %v5269_v13  ;;  %v4599_v49 = vpop.f32.mrb[15].mxu0  ;;  %v4828_v41 = vld [vmem:[%s5894_s12] sm:$0xff]  }
 0x75b   : > { %4609 = vmatpush3.bf16.msra.mxu0 %v4828_v41 }
 0x75c   : > { %v2005_v50 = vcombine.low %v1981_v45, %v1997_v47  ;;  %v2006_v51 = vcombine.high %v1981_v45, %v1997_v47  ;;  %v2021_v54 = vcombine.low %v1988_v46, %v2004_v48  ;;  %v2022_v62 = vcombine.high %v1988_v46, %v2004_v48  ;;  %4610 = vmatprep.subr.bf16.mxu0 %v4971_v2  ;;  %v4298_v48 = vld [vmem:[%s5892_s10] ss:$0 sm:$0xff] }
 0x75e   : > { %v2013_v56 = vrot.slane %v2005_v50, %v5272_v15  ;;  %v2020_v58 = vrot.slane %v2006_v51, %v5272_v15  ;;  %v2029_v60 = vrot.slane %v2021_v54, %v5272_v15  ;;  %v2036_v61 = vrot.slane %v2022_v62, %v5272_v15  ;;  %v4299_v50 = vld [vmem:[%s5893_s11] ss:$0 sm:$0xff] }
 0x75f   : > { %4611 = vmatpush3.bf16.msra.mxu0 %v4829_v43  ;;  %v4840_v43 = vld [vmem:[%s5938_s23 + $0x40] sm:$0xff]  }
 0x760   : > { %v2041_v63 = vcombine.low %v2013_v56, %v2020_v58  ;;  %v4292_v3 = vcombine.high %v2013_v56, %v2020_v58  ;;  %v2057_v4 = vcombine.low %v2029_v60, %v2036_v61  ;;  %v4293_v5 = vcombine.high %v2029_v60, %v2036_v61  ;;  %4636 = vmatprep.subr.bf16.mxu0 %v4971_v2  ;;  %v4832_v56 = vld [vmem:[%s5896_s14 + $0x10] sm:$0xff]   ;;  %v4833_v58 = vld [vmem:[%s5896_s14 + $0x18] sm:$0xff]   ;;  %v4834_v60 = vld [vmem:[%s5896_s14 + $0x20] sm:$0xff]  }
 0x761   : > { %v4835_v61 = vld [vmem:[%s5896_s14 + $0x28] sm:$0xff]  }
 0x762   : > { %v2048_v7 = vrot.slane %v2041_v63, %v5269_v13  ;;  %v2056_v9 = vrot.slane %v4292_v3, %v5269_v13  ;;  %v2064_v10 = vrot.slane %v2057_v4, %v5269_v13  ;;  %v2072_v11 = vrot.slane %v4293_v5, %v5269_v13  ;;  %v4836_v63 = vld [vmem:[%s5896_s14 + $0x30] sm:$0xff]   ;;  %v4837_v3 = vld [vmem:[%s5896_s14 + $0x38] sm:$0xff]   ;;  %v4300_v4 = vld [vmem:[%s5895_s13] ss:$0 sm:$0xff] }
 0x764   : > { %v2074_v14 = vcombine.high %v2048_v7, %v2056_v9  ;;  %v2090_v16 = vcombine.high %v2064_v10, %v2072_v11  ;;  %v2073_v17 = vcombine.low %v2048_v7, %v2056_v9  ;;  %v2089_v53 = vcombine.low %v2064_v10, %v2072_v11 }
 0x766   : > { %v2088_v18 = vrot.slane %v2074_v14, %v5272_v15  ;;  %v2104_v52 = vrot.slane %v2090_v16, %v5272_v15  ;;  %v2081_v19 = vrot.slane %v2073_v17, %v5272_v15  ;;  %v2097_v20 = vrot.slane %v2089_v53, %v5272_v15 }
 0x768   : > { %v2107_v57 = vcombine.low %v2088_v18, %v2104_v52  ;;  %v2106_v21 = vcombine.high %v2081_v19, %v2097_v20  ;;  %v2108_v22 = vcombine.high %v2088_v18, %v2104_v52  ;;  %v2105_v23 = vcombine.low %v2081_v19, %v2097_v20 }
 0x76a   : > { %2114 = vrot.lane.b32.xlu1 %v2107_v57, %s5916_s29  ;;  %2110 = vrot.lane.b32.xlu0 %v2106_v21, %s5915_s22  ;;  %v4304_v21 = vld [vmem:[%s5897_s15] ss:$0 sm:$0xff]  ;;  %s4982_s29 = smov [#allocation2]  }
 0x76b   : > { %s4910_s22 = sshll.u32 %s4982_s29, 4  ;;  %s4911_s22 = int_to_ptr.vmem [resolvable:$false] %s4910_s22 }
 0x76e   : > { %2118 = vrot.lane.b32.xlu0 %v2108_v22, %s5914_s25 }
 0x7dc   : > { %v2111_v24 = vpop.permute.xlu0 %2110  ;;  %v2115_v59 = vpop.permute.xlu1 %2114 }
 0x7dd   : > { %v2121_v25 = vsel %vm1545_vm5, %v2105_v23, %v2111_v24 }
 0x7de   : > { %v2123_v8 = vsel %vm2122_vm8, %v2121_v25, %v2115_v59 }
 0x7e0   : > { %v2119_v26 = vpop.permute.xlu0 %2118 }
 0x7e1   : > { %v2125_v27 = vsel %vm2124_vm9, %v2123_v8, %v2119_v26 }
 0x7e2   : > { %v2126_v28 = vpack.c.bf16 %v2125_v27, %v2125_v27 }
 0x7e4   : > { %4605 = vmatmul.mubr.msk.bf16.vlgmr.msra.gmra.mrb[32].mxu1 %vm810_vm4, %v2126_v28 }
 0x7e5   : > { %4632 = vmatprep.mubr.msk.bf16.mxu1 %vm4972_vm1, %v4971_v2 }
 0x8b7   : > { %v2187_v30 = vpop.f32.mrb[32].mxu1 }
 0x8b8   : > { %v2188_v31 = vadd.f32 %v4294_v29, %v2187_v30  ;;  %v4606_v32 = vpop.f32.mrb[33].mxu1 }
 0x8b9   : > { %v2190_v33 = vpop.f32.mrb[34].mxu1  ;;  %v4838_v32 = vld [vmem:[%s5938_s23 + $0x30] sm:$0xff]  }
 0x8ba   : > { %v4607_v34 = vpop.f32.mrb[35].mxu1  ;;  %v2193_v35 = vadd.f32 %v2188_v31, %v5220_v42  ;;  %v4830_v42 = vld [vmem:[%s5896_s14] sm:$0xff]   ;;  %v4839_v33 = vld [vmem:[%s5938_s23 + $0x38] sm:$0xff]  }
 0x8bb   : > { %4617 = vmatpush3.bf16.msra.mxu1 %v4830_v42 }
 0x8bc   : > { %v2196_v36 = vsel %vm810_vm4, %v2193_v35, 0.0  ;;  %4618 = vmatprep.subr.bf16.mxu1 %v4971_v2 }
 0x8bd   : > { %2197 = vadd.xlane.f32.xlu1 %v2196_v36 }
 0x8bf   : > { %4619 = vmatpush3.bf16.msra.mxu1 %v4831_v55 }
 0x8c0   : > { %4620 = vmatprep.subr.bf16.mxu1 %v4971_v2 }
 0x8c3   : > { %4621 = vmatpush3.bf16.msra.mxu1 %v4832_v56 }
 0x8c4   : > { %4622 = vmatprep.subr.bf16.mxu1 %v4971_v2 }
 0x8c7   : > { %4623 = vmatpush3.bf16.msra.mxu1 %v4833_v58 }
 0x8c8   : > { %4624 = vmatprep.subr.bf16.mxu1 %v4971_v2 }
 0x8cb   : > { %4625 = vmatpush3.bf16.msra.mxu1 %v4834_v60 }
 0x8cc   : > { %4626 = vmatprep.subr.bf16.mxu1 %v4971_v2 }
 0x8cf   : > { %4627 = vmatpush3.bf16.msra.mxu1 %v4835_v61 }
 0x8d0   : > { %4628 = vmatprep.subr.bf16.mxu1 %v4971_v2 }
 0x8d3   : > { %4629 = vmatpush3.bf16.msra.mxu1 %v4836_v63 }
 0x8d4   : > { %4630 = vmatprep.subr.bf16.mxu1 %v4971_v2 }
 0x8d7   : > { %4631 = vmatpush3.bf16.msra.mxu1 %v4837_v3 }
 0x8d8   : > { %4666 = vmatprep.subr.bf16.mxu1 %v4971_v2 }
 0x94a   : > { %v2198_v37 = vpop.xlane.xlu1 %2197 }
 0x94b   : > { %v2199_v38 = vmul.f32 0.03125, %v2198_v37 }
 0x94d   : > { %v2200_v0 = vsub.f32 %v2193_v35, %v2199_v38  ;;  %v4313_v38 = vld [vmem:[%s5898_s16] ss:$0 sm:$0xff] }
 0x94f   : > { %v2201_v39 = vmul.f32 %v2200_v0, %v2200_v0 }
 0x951   : > { %v2202_v40 = vsel %vm810_vm4, %v2201_v39, 0.0  ;;  %v4314_v39 = vld [vmem:[%s5899_s17] ss:$0 sm:$0xff] }
 0x952   : > { %2203 = vadd.xlane.f32.xlu0 %v2202_v40 }
 0x9df   : > { %v2204_v44 = vpop.xlane.xlu0 %2203 }
 0x9e0   : > { %v2205_v45 = vmul.f32 0.03125, %v2204_v44  ;;  %v4841_v44 = vld [vmem:[%s5938_s23 + $0x48] sm:$0xff]  }
 0x9e2   : > { %v2206_v46 = vadd.f32 1e-12, %v2205_v45  ;;  %v4842_v45 = vld [vmem:[%s5938_s23 + $0x50] sm:$0xff]  }
 0x9e4   : > { %4878 = vrsqrt.f32 %v2206_v46  ;;  %v4843_v46 = vld [vmem:[%s5938_s23 + $0x58] sm:$0xff]  }
 0x9ee   : > { %v4879_v47 = vpop.eup %4878 }
 0x9ef   : > { %v2208_v49 = vmul.f32 %v4879_v47, %v2200_v0 }
 0x9f1   : > { %v2215_v51 = vmul.f32 %v4298_v48, %v2208_v49 }
 0x9f3   : > { %v2222_v54 = vadd.f32 %v4299_v50, %v2215_v51  ;;  %v4329_v51 = vld [vmem:[%s5889_s7 + $0x4] ss:$0 sm:$0xff] }
 0x9f5   : > { %v2223_v62 = vpack.c.bf16 %v2222_v54, %v2222_v54 }
 0x9f7   : > { %4613 = vmatmul.mubr.msk.bf16.vlgmr.msra.gmra.mrb[16].mxu0 %vm810_vm4, %v2223_v62 }
 0x9f8   : > { %4640 = vmatprep.mubr.msk.bf16.mxu0 %vm4972_vm1, %v4971_v2  ;;  %4637 = vmatpush3.bf16.msra.mxu0 %v4838_v32 }
 0x9f9   : > { %4638 = vmatprep.subr.bf16.mxu0 %v4971_v2 }
 0x9fc   : > { %4639 = vmatpush3.bf16.msra.mxu0 %v4839_v33 }
 0x9fd   : > { %4644 = vmatprep.subr.bf16.mxu0 %v4971_v2 }
 0xaca   : > { %v2284_v5 = vpop.f32.mrb[16].mxu0 }
 0xacb   : > { %v2285_v6 = vadd.f32 %v4300_v4, %v2284_v5  ;;  %v4614_v7 = vpop.f32.mrb[17].mxu0 }
 0xacc   : > { %v2287_v9 = vpop.f32.mrb[18].mxu0 }
 0xacd   : > { %v2291_v10 = vmul.f32 0.044715, %v2285_v6  ;;  %v4615_v11 = vpop.f32.mrb[19].mxu0  ;;  %v2290_v52 = vmul.f32 0.5, %v2285_v6 }
 0xacf   : > { %v2292_v14 = vmul.f32 %v2291_v10, %v2285_v6 }
 0xad1   : > { %v2293_v16 = vmul.f32 %v2292_v14, %v2285_v6 }
 0xad3   : > { %v2294_v17 = vadd.f32 %v2293_v16, %v2285_v6 }
 0xad5   : > { %v2295_v53 = vmul.f32 0.7978846, %v2294_v17 }
 0xad7   : > { %4880 = vtanh.f32 %v2295_v53 }
 0xae1   : > { %v4881_v18 = vpop.eup %4880 }
 0xae2   : > { %v2297_v19 = vadd.f32 1.0, %v4881_v18 }
 0xae4   : > { %v2298_v20 = vmul.f32 %v2297_v19, %v2290_v52 }
 0xae6   : > { %v2299_v57 = vpack.c.bf16 %v2298_v20, %v2298_v20 }
 0xae8   : > { %4633 = vmatmul.mubr.bf16.vlgmr.msra.gmra.mrb[36].mxu1 %v2299_v57 }
 0xae9   : > { %4668 = vmatprep.mubr.msk.bf16.mxu1 %vm4972_vm1, %v4971_v2 }
 0xbbb   : > { %v2405_v22 = vpop.f32.mrb[36].mxu1 }
 0xbbc   : > { %v2406_v23 = vadd.f32 %v4304_v21, %v2405_v22  ;;  %v4634_v24 = vpop.f32.mrb[37].mxu1 }
 0xbbd   : > { %v2408_v59 = vpop.f32.mrb[38].mxu1 }
 0xbbe   : > { %v4635_v25 = vpop.f32.mrb[39].mxu1  ;;  %v2411_v26 = vadd.f32 %v2406_v23, %v2222_v54  ;;  %v4320_v54 = vld [vmem:[%s5889_s7 + $0x3] ss:$0 sm:$0xff] }
 0xbc0   : > { %v2414_v8 = vsel %vm810_vm4, %v2411_v26, 0.0 }
 0xbc1   : > { %2415 = vadd.xlane.f32.xlu0 %v2414_v8 }
 0xc4e   : > { %v2416_v27 = vpop.xlane.xlu0 %2415 }
 0xc4f   : > { %v2417_v28 = vmul.f32 0.03125, %v2416_v27 }
 0xc51   : > { %v2418_v29 = vsub.f32 %v2411_v26, %v2417_v28 }
 0xc53   : > { %v2419_v30 = vmul.f32 %v2418_v29, %v2418_v29 }
 0xc55   : > { %v2420_v31 = vsel %vm810_vm4, %v2419_v30, 0.0 }
 0xc56   : > { %2421 = vadd.xlane.f32.xlu1 %v2420_v31 }
 0xce3   : > { %v2422_v34 = vpop.xlane.xlu1 %2421 }
 0xce4   : > { %v2423_v35 = vmul.f32 0.03125, %v2422_v34 }
 0xce6   : > { %v2424_v36 = vadd.f32 1e-12, %v2423_v35 }
 0xce8   : > { %4882 = vrsqrt.f32 %v2424_v36 }
 0xcf2   : > { %v4883_v37 = vpop.eup %4882 }
 0xcf3   : > { %v2426_v0 = vmul.f32 %v4883_v37, %v2418_v29 }
 0xcf5   : > { %v2433_v40 = vmul.f32 %v4313_v38, %v2426_v0 }
 0xcf7   : > { %v5527_v41 = vadd.f32 %v4314_v39, %v2433_v40 }
 0xcf9   : > { %v2441_v42 = vpack.c.bf16 %v5527_v41, %v5527_v41 }
 0xcfb   : > { %4641 = vmatmul.mubr.msk.bf16.vlgmr.msra.gmra.mrb[20].mxu0 %vm810_vm4, %v2441_v42 }
 0xcfc   : > { %4645 = vmatpush3.bf16.msra.mxu0 %v4840_v43  ;;  %4648 = vmatprep.mubr.msk.bf16.mxu0 %vm4972_vm1, %v4971_v2 }
 0xcfd   : > { %4646 = vmatprep.subr.bf16.mxu0 %v4971_v2 }
 0xd00   : > { %4647 = vmatpush3.bf16.msra.mxu0 %v4841_v44 }
 0xd01   : > { %4652 = vmatprep.subr.bf16.mxu0 %v4971_v2 }
 0xd03   : > { %4649 = vmatmul.mubr.msk.bf16.vlgmr.msra.gmra.mrb[24].mxu0 %vm810_vm4, %v2441_v42 }
 0xd04   : > { %4653 = vmatpush3.bf16.msra.mxu0 %v4842_v45  ;;  %4656 = vmatprep.mubr.msk.bf16.mxu0 %vm4972_vm1, %v4971_v2 }
 0xd05   : > { %4654 = vmatprep.subr.bf16.mxu0 %v4971_v2 }
 0xd08   : > { %4655 = vmatpush3.bf16.msra.mxu0 %v4843_v46 }
 0xd09   : > { %4660 = vmatprep.subr.bf16.mxu0 %v4971_v2 }
 0xd0b   : > { %4657 = vmatmul.mubr.msk.bf16.vlgmr.msra.gmra.mrb[28].mxu0 %vm810_vm4, %v2441_v42 }
 0xd0c   : > { %4662 = vmatprep.mubr.msk.bf16.mxu0 %vm4972_vm1, %v4971_v2 }
 0xdce   : > { %v2504_v47 = vpop.f32.mrb[20].mxu0 }
 0xdcf   : > { %v4642_v48 = vpop.f32.mrb[21].mxu0  ;;  %v2505_v60 = vadd.f32 %v4320_v54, %v2504_v47 }
 0xdd0   : > { %v2507_v49 = vpop.f32.mrb[22].mxu0 }
 0xdd1   : > { %v4643_v50 = vpop.f32.mrb[23].mxu0  ;;  %v2640_v3 = vpack.c.bf16 %v2505_v60, %v2505_v60 }
 0xdd3   : > { %v2654_v25 = vrot.slane %v2640_v3, %v5269_v13 }
 0xdd6   : > { %v2569_v62 = vpop.f32.mrb[24].mxu0 }
 0xdd7   : > { %v2570_v55 = vadd.f32 %v4329_v51, %v2569_v62  ;;  %v4650_v56 = vpop.f32.mrb[25].mxu0 }
 0xdd8   : > { %v2572_v58 = vpop.f32.mrb[26].mxu0 }
 0xdd9   : > { %v2809_v61 = vpack.c.bf16 %v2570_v55, %v2570_v55  ;;  %v4651_v63 = vpop.f32.mrb[27].mxu0 }
 0xddb   : > { %2813 = vrot.lane.b32.xlu1 %v2809_v61, %s4976_s24  ;;  %2811 = vrot.lane.b32.xlu0 %v2809_v61, %s4975_s30  ;;  %v2823_v11 = vrot.slane %v2809_v61, %v5269_v13 }
 0xdde   : > { %v5564_v4 = vpop.f32.mrb[28].mxu0 }
 0xddf   : > { %2815 = vrot.lane.b32.xlu1 %v2809_v61, %s4974_s3  ;;  %2642 = vrot.lane.b32.xlu0 %v2640_v3, %s4975_s30  ;;  %v4658_v5 = vpop.f32.mrb[29].mxu0 }
 0xde0   : > { %v2637_v6 = vpop.f32.mrb[30].mxu0 }
 0xde1   : > { %v4659_v7 = vpop.f32.mrb[31].mxu0 }
 0xde3   : > { %2644 = vrot.lane.b32.xlu1 %v2640_v3, %s4976_s24  ;;  %2646 = vrot.lane.b32.xlu0 %v2640_v3, %s4974_s3 }
 0xe4d   : > { %v2814_v9 = vpop.permute.xlu1 %2813  ;;  %v2812_v10 = vpop.permute.xlu0 %2811 }
 0xe4e   : > { %v2831_v14 = vrot.slane %v2814_v9, %v5269_v13  ;;  %v2857_v57 = vrot.slane %v2812_v10, %v5269_v13 }
 0xe50   : > { %v2832_v16 = vcombine.low %v2823_v11, %v2831_v14  ;;  %v2833_v17 = vcombine.high %v2823_v11, %v2831_v14 }
 0xe51   : > { %v2816_v53 = vpop.permute.xlu1 %2815  ;;  %v2643_v18 = vpop.permute.xlu0 %2642 }
 0xe52   : > { %v2840_v52 = vrot.slane %v2832_v16, %v5272_v15  ;;  %v2847_v19 = vrot.slane %v2833_v17, %v5272_v15  ;;  %v2865_v20 = vrot.slane %v2816_v53, %v5269_v13  ;;  %v2688_v59 = vrot.slane %v2643_v18, %v5269_v13 }
 0xe54   : > { %v2848_v21 = vcombine.high %v2840_v52, %v4970_v1  ;;  %v2849_v22 = vcombine.high %v2847_v19, %v4970_v1  ;;  %v2866_v23 = vcombine.low %v2857_v57, %v2865_v20  ;;  %v2867_v24 = vcombine.high %v2857_v57, %v2865_v20 }
 0xe55   : > { %v2645_v26 = vpop.permute.xlu1 %2644  ;;  %v2647_v8 = vpop.permute.xlu0 %2646  ;;  %v2888_v27 = vshrl.u32 %v2840_v52, 16  ;;  %v2904_v28 = vshrl.u32 %v2847_v19, 16 }
 0xe56   : > { %v2662_v29 = vrot.slane %v2645_v26, %v5269_v13  ;;  %v2696_v30 = vrot.slane %v2647_v8, %v5269_v13  ;;  %v2896_v31 = vshrl.u32 %v2848_v21, 16  ;;  %v2912_v32 = vshrl.u32 %v2849_v22, 16 }
 0xe57   : > { %v2874_v33 = vrot.slane %v2866_v23, %v5272_v15  ;;  %v2881_v34 = vrot.slane %v2867_v24, %v5272_v15 }
 0xe58   : > { %v2663_v35 = vcombine.low %v2654_v25, %v2662_v29  ;;  %v2664_v36 = vcombine.high %v2654_v25, %v2662_v29  ;;  %v2697_v37 = vcombine.low %v2688_v59, %v2696_v30  ;;  %v2698_v38 = vcombine.high %v2688_v59, %v2696_v30 }
 0xe59   : > { %v2882_v0 = vcombine.high %v2874_v33, %v4970_v1  ;;  %v2883_v39 = vcombine.high %v2881_v34, %v4970_v1  ;;  %v2886_v40 = vpack.i.b16 %v2874_v33, %v2840_v52  ;;  %v2889_v43 = vshrl.u32 %v2874_v33, 16 }
 0xe5a   : > { %v2902_v42 = vpack.i.b16 %v2881_v34, %v2847_v19  ;;  %v2905_v44 = vshrl.u32 %v2881_v34, 16  ;;  %v2671_v45 = vrot.slane %v2663_v35, %v5272_v15  ;;  %v2678_v46 = vrot.slane %v2664_v36, %v5272_v15 }
 0xe5b   : > { %v2890_v47 = vpack.i.b16 %v2889_v43, %v2888_v27  ;;  %v2894_v48 = vpack.i.b16 %v2882_v0, %v2848_v21  ;;  %v2897_v49 = vshrl.u32 %v2882_v0, 16  ;;  %v2910_v50 = vpack.i.b16 %v2883_v39, %v2849_v22 }
 0xe5c   : > { %v2906_v51 = vpack.i.b16 %v2905_v44, %v2904_v28  ;;  %v2913_v54 = vshrl.u32 %v2883_v39, 16  ;;  %v2916_v62 = vcombine.low %v2886_v40, %v2902_v42  ;;  %v2679_v55 = vcombine.high %v2671_v45, %v4970_v1 }
 0xe5d   : > { %v2898_v56 = vpack.i.b16 %v2897_v49, %v2896_v31  ;;  %v2924_v58 = vcombine.low %v2894_v48, %v2910_v50  ;;  %v2680_v60 = vcombine.high %v2678_v46, %v4970_v1  ;;  %v2719_v5 = vshrl.u32 %v2671_v45, 16 }
 0xe5e   : > { %v2914_v61 = vpack.i.b16 %v2913_v54, %v2912_v32  ;;  %v2923_v63 = vrot.slane %v2916_v62, %v5269_v13  ;;  %v2941_v3 = vcombine.low %v2890_v47, %v2906_v51  ;;  %v2727_v6 = vshrl.u32 %v2679_v55, 16 }
 0xe5f   : > { %v2735_v7 = vshrl.u32 %v2678_v46, 16  ;;  %v2705_v9 = vrot.slane %v2697_v37, %v5272_v15  ;;  %v2712_v10 = vrot.slane %v2698_v38, %v5272_v15  ;;  %v2743_v14 = vshrl.u32 %v2680_v60, 16 }
 0xe60   : > { %v2949_v11 = vcombine.low %v2898_v56, %v2914_v61  ;;  %v2931_v16 = vrot.slane %v2924_v58, %v5269_v13  ;;  %v2948_v17 = vrot.slane %v2941_v3, %v5269_v13 }
 0xe61   : > { %v2713_v53 = vcombine.high %v2705_v9, %v4970_v1  ;;  %v2714_v18 = vcombine.high %v2712_v10, %v4970_v1  ;;  %v2717_v52 = vpack.i.b16 %v2705_v9, %v2671_v45  ;;  %v2720_v19 = vshrl.u32 %v2705_v9, 16 }
 0xe62   : > { %v2733_v20 = vpack.i.b16 %v2712_v10, %v2678_v46  ;;  %v2736_v57 = vshrl.u32 %v2712_v10, 16  ;;  %v2932_v21 = vcombine.low %v2923_v63, %v2931_v16  ;;  %v2956_v22 = vrot.slane %v2949_v11, %v5269_v13 }
 0xe63   : > { %v2721_v23 = vpack.i.b16 %v2720_v19, %v2719_v5  ;;  %v2725_v24 = vpack.i.b16 %v2713_v53, %v2679_v55  ;;  %v2728_v59 = vshrl.u32 %v2713_v53, 16  ;;  %v2741_v25 = vpack.i.b16 %v2714_v18, %v2680_v60 }
 0xe64   : > { %v2737_v26 = vpack.i.b16 %v2736_v57, %v2735_v7  ;;  %v2744_v8 = vshrl.u32 %v2714_v18, 16  ;;  %v2747_v27 = vcombine.low %v2717_v52, %v2733_v20  ;;  %v2939_v28 = vrot.slane %v2932_v21, %v5272_v15 }
 0xe65   : > { %v2729_v29 = vpack.i.b16 %v2728_v59, %v2727_v6  ;;  %v2755_v30 = vcombine.low %v2725_v24, %v2741_v25  ;;  %v2957_v31 = vcombine.low %v2948_v17, %v2956_v22 }
 0xe66   : > { %v2745_v32 = vpack.i.b16 %v2744_v8, %v2743_v14  ;;  %v2772_v33 = vcombine.low %v2721_v23, %v2737_v26  ;;  %v2754_v34 = vrot.slane %v2747_v27, %v5269_v13  ;;  %v2969_v38 = vshrl.u32 %v2939_v28, 16 }
 0xe67   : > { %v2762_v35 = vrot.slane %v2755_v30, %v5269_v13  ;;  %v2964_v36 = vrot.slane %v2957_v31, %v5272_v15  ;;  %v2940_v47 = vcombine.high %v2939_v28, %v4970_v1 }
 0xe68   : > { %v2780_v37 = vcombine.low %v2729_v29, %v2745_v32  ;;  %v2779_v42 = vrot.slane %v2772_v33, %v5269_v13 }
 0xe69   : > { %v2763_v0 = vcombine.low %v2754_v34, %v2762_v35  ;;  %v2968_v39 = vpack.i.b16 %v2964_v36, %v2939_v28  ;;  %v2970_v40 = vshrl.u32 %v2964_v36, 16  ;;  %v2965_v43 = vcombine.high %v2964_v36, %v4970_v1  ;;  %v4338_v35 = vld [vmem:[%s5889_s7 + $0x5] ss:$0 sm:$0xff] }
 0xe6a   : > { %v2787_v44 = vrot.slane %v2780_v37, %v5269_v13  ;;  %v2975_v55 = vshrl.u32 %v2940_v47, 16  ;;  %v2635_v36 = vadd.f32 %v4338_v35, %v5564_v4 }
 0xe6b   : > { %v3151_v45 = vsel %vm1545_vm5, %v2968_v39, 0  ;;  %v2971_v46 = vpack.i.b16 %v2970_v40, %v2969_v38  ;;  %v2770_v50 = vrot.slane %v2763_v0, %v5272_v15  ;;  %v2976_v51 = vshrl.u32 %v2965_v43, 16 }
 0xe6c   : > { %v2788_v48 = vcombine.low %v2779_v42, %v2787_v44  ;;  %4661 = vmatpush3.bf16.xpose.msra.mxu0 %v3151_v45  ;;  %v2974_v62 = vpack.i.b16 %v2965_v43, %v2940_v47  ;;  %v2978_v37 = vpack.c.bf16 %v2635_v36, %v2635_v36 }
 0xe6d   : > { %v3197_v49 = vsel %vm1545_vm5, %v2971_v46, 0  ;;  %4672 = vmatprep.subr.bf16.mxu0 %v4971_v2  ;;  %v2800_v60 = vshrl.u32 %v2770_v50, 16  ;;  %v2977_v61 = vpack.i.b16 %v2976_v51, %v2975_v55  ;;  %v2771_v7 = vcombine.high %v2770_v50, %v4970_v1 }
 0xe6e   : > { %4667 = vmatpush3.bf16.xpose.msra.mxu1 %v3197_v49  ;;  %v2795_v54 = vrot.slane %v2788_v48, %v5272_v15  ;;  %v3243_v63 = vsel %vm1545_vm5, %v2974_v62, 0 }
 0xe6f   : > { %4678 = vmatprep.subr.bf16.mxu1 %v4971_v2  ;;  %v3289_v6 = vsel %vm1545_vm5, %v2977_v61, 0  ;;  %v2806_v11 = vshrl.u32 %v2771_v7, 16  ;;  %v2992_v61 = vrot.slane %v2978_v37, %v5269_v13 }
 0xe70   : > { %v2801_v56 = vshrl.u32 %v2795_v54, 16  ;;  %v2799_v58 = vpack.i.b16 %v2795_v54, %v2770_v50  ;;  %v2796_v5 = vcombine.high %v2795_v54, %v4970_v1 }
 0xe72   : > { %v2802_v3 = vpack.i.b16 %v2801_v56, %v2800_v60  ;;  %v2807_v9 = vshrl.u32 %v2796_v5, 16  ;;  %v2805_v10 = vpack.i.b16 %v2796_v5, %v2771_v7 }
 0xe73   : > { %4663 = vmatmul.mubr.msk.bf16.vlgmr.msra.gmra.mrb[32].mxu0 %vm1545_vm5, %v2799_v58 }
 0xe74   : > { %4673 = vmatpush3.bf16.xpose.msra.mxu0 %v3243_v63  ;;  %4674 = vmatprep.mubr.msk.bf16.mxu0 %vm4972_vm1, %v4971_v2  ;;  %v2808_v14 = vpack.i.b16 %v2807_v9, %v2806_v11 }
 0xe75   : > { %4669 = vmatmul.mubr.msk.bf16.vlgmr.msra.gmra.mrb[40].mxu1 %vm1545_vm5, %v2802_v3  ;;  %4684 = vmatprep.subr.bf16.mxu0 %v4971_v2 }
 0xe76   : > { %4679 = vmatpush3.bf16.xpose.msra.mxu1 %v3289_v6  ;;  %4680 = vmatprep.mubr.msk.bf16.mxu1 %vm4972_vm1, %v4971_v2 }
 0xe77   : > { %4690 = vmatprep.subr.bf16.mxu1 %v4971_v2 }
 0xe7b   : > { %4675 = vmatmul.mubr.msk.bf16.vlgmr.msra.gmra.mrb[36].mxu0 %vm1545_vm5, %v2805_v10 }
 0xe7c   : > { %4686 = vmatprep.mubr.msk.bf16.mxu0 %vm4972_vm1, %v4971_v2 }
 0xe7d   : > { %4681 = vmatmul.mubr.msk.bf16.vlgmr.msra.gmra.mrb[44].mxu1 %vm1545_vm5, %v2808_v14 }
 0xe7e   : > { %4692 = vmatprep.mubr.msk.bf16.mxu1 %vm4972_vm1, %v4971_v2 }
 0xf46   : > { %v3187_v16 = vpop.f32.mrb[32].mxu0 }
 0xf47   : > { %v3331_v17 = vsel %vm1735_vm6, %v3187_v16, -3.4028235e+38  ;;  %v4664_v53 = vpop.f32.mrb[33].mxu0 }
 0xf48   : > { %v3190_v18 = vpop.f32.mrb[34].mxu0  ;;  %v3233_v52 = vpop.f32.mrb[40].mxu1  ;;  %v3335_v19 = vsel %vm1545_vm5, %v3331_v17, -inf }
 0xf49   : > { %v3332_v20 = vsel %vm1735_vm6, %v3233_v52, -3.4028235e+38  ;;  %v4670_v57 = vpop.f32.mrb[41].mxu1  ;;  %3336 = vmax.xlane.f32.xlu1 %v3335_v19  ;;  %v4665_v21 = vpop.f32.mrb[35].mxu0 }
 0xf4a   : > { %v3236_v22 = vpop.f32.mrb[42].mxu1  ;;  %v3338_v23 = vsel %vm1545_vm5, %v3332_v20, -inf }
 0xf4b   : > { %3339 = vmax.xlane.f32.xlu0 %v3338_v23  ;;  %v4671_v24 = vpop.f32.mrb[43].mxu1 }
 0xf4e   : > { %v3279_v59 = vpop.f32.mrb[36].mxu0 }
 0xf4f   : > { %v3333_v25 = vsel %vm1735_vm6, %v3279_v59, -3.4028235e+38  ;;  %v4676_v26 = vpop.f32.mrb[37].mxu0 }
 0xf50   : > { %v3282_v8 = vpop.f32.mrb[38].mxu0  ;;  %v3325_v27 = vpop.f32.mrb[44].mxu1  ;;  %v3341_v28 = vsel %vm1545_vm5, %v3333_v25, -inf }
 0xf51   : > { %v3334_v29 = vsel %vm1735_vm6, %v3325_v27, -3.4028235e+38  ;;  %v4682_v30 = vpop.f32.mrb[45].mxu1  ;;  %3342 = vmax.xlane.f32.xlu0 %v3341_v28  ;;  %v4677_v31 = vpop.f32.mrb[39].mxu0 }
 0xf52   : > { %v3328_v32 = vpop.f32.mrb[46].mxu1  ;;  %v3344_v33 = vsel %vm1545_vm5, %v3334_v29, -inf }
 0xf53   : > { %v4683_v34 = vpop.f32.mrb[47].mxu1  ;;  %3345 = vmax.xlane.f32.xlu1 %v3344_v33 }
 0xf64   : > { %2982 = vrot.lane.b32.xlu1 %v2978_v37, %s4976_s24  ;;  %s4912_s24 = scalar_lea.vmem %s4911_s22, 32 }
 0xfd6   : > { %v3337_v38 = vpop.xlane.xlu1 %3336 }
 0xfd7   : > { %v3347_v12 = vsub.f32 %v3331_v17, %v3337_v38 }
 0xfd8   : > { %v3340_v0 = vpop.xlane.xlu0 %3339 }
 0xfd9   : > { %v3351_v39 = vmul.f32 1.442695, %v3347_v12  ;;  %v3348_v40 = vsub.f32 %v3332_v20, %v3340_v0 }
 0xfdb   : > { %4884 = vpow2.f32 %v3351_v39  ;;  %v3353_v43 = vmul.f32 1.442695, %v3348_v40 }
 0xfdd   : > { %4886 = vpow2.f32 %v3353_v43 }
 0xfde   : > { %v3343_v46 = vpop.xlane.xlu0 %3342 }
 0xfdf   : > { %v3349_v48 = vsub.f32 %v3333_v25, %v3343_v46 }
 0xfe0   : > { %v3346_v47 = vpop.xlane.xlu1 %3345 }
 0xfe1   : > { %v3350_v49 = vsub.f32 %v3334_v29, %v3346_v47  ;;  %v3355_v50 = vmul.f32 1.442695, %v3349_v48 }
 0xfe3   : > { %v3357_v51 = vmul.f32 1.442695, %v3350_v49  ;;  %4888 = vpow2.f32 %v3355_v50 }
 0xfe4   : > { %v2983_v58 = vpop.permute.xlu1 %2982 }
 0xfe5   : > { %v5647_v42 = vpop.eup %4884  ;;  %4890 = vpow2.f32 %v3357_v51  ;;  %v3000_v60 = vrot.slane %v2983_v58, %v5269_v13 }
 0xfe6   : > { %v3359_v44 = vsel %vm1545_vm5, %v5647_v42, 0.0 }
 0xfe7   : > { %v5651_v45 = vpop.eup %4886  ;;  %3360 = vadd.xlane.f32.xlu0 %v3359_v44  ;;  %v3001_v63 = vcombine.low %v2992_v61, %v3000_v60  ;;  %v3002_v5 = vcombine.high %v2992_v61, %v3000_v60 }
 0xfe8   : > { %v3362_v4 = vsel %vm1545_vm5, %v5651_v45, 0.0 }
 0xfe9   : > { %3363 = vadd.xlane.f32.xlu1 %v3362_v4  ;;  %v3009_v7 = vrot.slane %v3001_v63, %v5272_v15  ;;  %v3016_v10 = vrot.slane %v3002_v5, %v5272_v15 }
 0xfeb   : > { %v3017_v17 = vcombine.high %v3009_v7, %v4970_v1  ;;  %v3018_v52 = vcombine.high %v3016_v10, %v4970_v1  ;;  %v3057_v57 = vshrl.u32 %v3009_v7, 16  ;;  %v3073_v22 = vshrl.u32 %v3016_v10, 16 }
 0xfed   : > { %v5657_v54 = vpop.eup %4888  ;;  %v3065_v21 = vshrl.u32 %v3017_v17, 16  ;;  %v3081_v26 = vshrl.u32 %v3018_v52, 16 }
 0xfee   : > { %v3365_v55 = vsel %vm1545_vm5, %v5657_v54, 0.0 }
 0xfef   : > { %v5659_v62 = vpop.eup %4890 }
 0xff0   : > { %v3368_v56 = vsel %vm1545_vm5, %v5659_v62, 0.0 }
 0xffa   : > { %2984 = vrot.lane.b32.xlu1 %v2978_v37, %s4974_s3  ;;  %s684_s3 = scalar_lea.vmem [#allocation2], %s683_s5 }
 0xffd   : > { %2980 = vrot.lane.b32.xlu0 %v2978_v37, %s4975_s30  ;;  %s4180_s30 = sshll.u32 %s684_s3, 4  ;;  %s5842_s30 = int_to_ptr.vmem [resolvable:$true] %s4180_s30 }
 0xffe   : > { %s4906_s4 = scalar_lea.vmem %s5842_s30, 16  ;;  %p4913_p0 = scmp.lt.s32.totalorder %s5842_s30, %s4911_s22 }
 0xfff   : > { %p4907_p11 = scmp.ne.s32.totalorder %s5842_s30, %s4906_s4  ;;  %p4914_p1 = scmp.lt.s32.totalorder %s4912_s24, %s4906_s4 }
0x1001   : > { %p4908_p12 = pnand %p4907_p11, %p5136_p5  ;;  %p4915_p2 = por %p4914_p1, %p4913_p0 }
0x1003   : > { %p4909_p13 = pneg %p4908_p12 }
0x1005   : > { %p4916_p3 = pnand %p4915_p2, %p4909_p13 }
0x101c   : > { %3366 = vadd.xlane.f32.xlu0 %v3365_v55 }
0x101e   : > { %3369 = vadd.xlane.f32.xlu1 %v3368_v56 }
0x1074   : > { %v3361_v3 = vpop.xlane.xlu0 %3360 }
0x1075   : > { %4892 = vrcp.f32 %v3361_v3 }
0x1076   : > { %v3364_v6 = vpop.xlane.xlu1 %3363 }
0x1077   : > { %4894 = vrcp.f32 %v3364_v6 }
0x1078   : > { %v2981_v9 = vpop.permute.xlu0 %2980 }
0x1079   : > { %v3026_v14 = vrot.slane %v2981_v9, %v5269_v13 }
0x107a   : > { %v2985_v11 = vpop.permute.xlu1 %2984 }
0x107b   : > { %v3034_v16 = vrot.slane %v2985_v11, %v5269_v13 }
0x107d   : > { %v3035_v53 = vcombine.low %v3026_v14, %v3034_v16  ;;  %v3036_v18 = vcombine.high %v3026_v14, %v3034_v16 }
0x107f   : > { %v3043_v19 = vrot.slane %v3035_v53, %v5272_v15  ;;  %v3050_v20 = vrot.slane %v3036_v18, %v5272_v15  ;;  %v4893_v46 = vpop.eup %4892 }
0x1080   : > { %v3375_v51 = vmul.f32 %v4893_v46, %v5647_v42 }
0x1081   : > { %v3051_v23 = vcombine.high %v3043_v19, %v4970_v1  ;;  %v3052_v24 = vcombine.high %v3050_v20, %v4970_v1  ;;  %v3055_v59 = vpack.i.b16 %v3043_v19, %v3009_v7  ;;  %v3058_v25 = vshrl.u32 %v3043_v19, 16  ;;  %v4895_v49 = vpop.eup %4894 }
0x1082   : > { %v3071_v8 = vpack.i.b16 %v3050_v20, %v3016_v10  ;;  %v3074_v27 = vshrl.u32 %v3050_v20, 16  ;;  %v3376_v61 = vmul.f32 %v4895_v49, %v5651_v45  ;;  %v3379_v10 = vpack.c.bf16 %v3375_v51, %v3375_v51 }
0x1083   : > { %v3059_v28 = vpack.i.b16 %v3058_v25, %v3057_v57  ;;  %v3063_v29 = vpack.i.b16 %v3051_v23, %v3017_v17  ;;  %v3066_v30 = vshrl.u32 %v3051_v23, 16  ;;  %v3079_v31 = vpack.i.b16 %v3052_v24, %v3018_v52 }
0x1084   : > { %v3075_v32 = vpack.i.b16 %v3074_v27, %v3073_v22  ;;  %v3082_v33 = vshrl.u32 %v3052_v24, 16  ;;  %v3085_v34 = vcombine.low %v3055_v59, %v3071_v8  ;;  %v3380_v11 = vpack.c.bf16 %v3376_v61, %v3376_v61 }
0x1085   : > { %v3067_v35 = vpack.i.b16 %v3066_v30, %v3065_v21  ;;  %v3093_v36 = vcombine.low %v3063_v29, %v3079_v31 }
0x1086   : > { %v3083_v37 = vpack.i.b16 %v3082_v33, %v3081_v26  ;;  %v3110_v38 = vcombine.low %v3059_v28, %v3075_v32  ;;  %v3092_v12 = vrot.slane %v3085_v34, %v5269_v13 }
0x1087   : > { %v3100_v0 = vrot.slane %v3093_v36, %v5269_v13 }
0x1088   : > { %v3118_v39 = vcombine.low %v3067_v35, %v3083_v37  ;;  %v3117_v43 = vrot.slane %v3110_v38, %v5269_v13 }
0x1089   : > { %v3101_v40 = vcombine.low %v3092_v12, %v3100_v0 }
0x108a   : > { %v3125_v44 = vrot.slane %v3118_v39, %v5269_v13 }
0x108b   : > { %v3108_v4 = vrot.slane %v3101_v40, %v5272_v15 }
0x108c   : > { %v3126_v47 = vcombine.low %v3117_v43, %v3125_v44  ;;  %v4844_v44 = vld [vmem:[%s5890_s8 + $0x10] sm:$0xff]  }
0x108d   : > { %v3109_v48 = vcombine.high %v3108_v4, %v4970_v1  ;;  %v3138_v56 = vshrl.u32 %v3108_v4, 16 }
0x108e   : > { %v3133_v50 = vrot.slane %v3126_v47, %v5272_v15 }
0x108f   : > { %v3144_v63 = vshrl.u32 %v3109_v48, 16 }
0x1090   : > { %v3137_v55 = vpack.i.b16 %v3133_v50, %v3108_v4  ;;  %v3139_v58 = vshrl.u32 %v3133_v50, 16  ;;  %v3134_v60 = vcombine.high %v3133_v50, %v4970_v1 }
0x1092   : > { %v3387_v3 = vsel %vm1791_vm7, %v3137_v55, 0  ;;  %v3140_v5 = vpack.i.b16 %v3139_v58, %v3138_v56  ;;  %v3143_v6 = vpack.i.b16 %v3134_v60, %v3109_v48  ;;  %v3145_v7 = vshrl.u32 %v3134_v60, 16 }
0x1093   : > { %4685 = vmatpush3.bf16.msra.mxu0 %v3387_v3 }
0x1094   : > { %v3433_v9 = vsel %vm1791_vm7, %v3140_v5, 0  ;;  %4696 = vmatprep.subr.bf16.mxu0 %v4971_v2  ;;  %v3146_v42 = vpack.i.b16 %v3145_v7, %v3144_v63  ;;  %v3479_v1 = vsel %vm1791_vm7, %v3143_v6, 0  ;;  %v4845_v63 = vld [vmem:[%s5890_s8 + $0x18] sm:$0xff]  }
0x1095   : > { %4691 = vmatpush3.bf16.msra.mxu1 %v3433_v9 }
0x1096   : > { %4687 = vmatmul.mubr.msk.bf16.vlgmr.msra.gmra.mrb[40].mxu0 %vm1545_vm5, %v3379_v10  ;;  %4702 = vmatprep.subr.bf16.mxu1 %v4971_v2  ;;  %v3525_v45 = vsel %vm1791_vm7, %v3146_v42, 0 }
0x1097   : > { %4697 = vmatpush3.bf16.msra.mxu0 %v3479_v1  ;;  %4698 = vmatprep.mubr.msk.bf16.mxu0 %vm4972_vm1, %v4971_v2 }
0x1098   : > { %4693 = vmatmul.mubr.msk.bf16.vlgmr.msra.gmra.mrb[48].mxu1 %vm1545_vm5, %v3380_v11  ;;  %4708 = vmatprep.subr.bf16.mxu0 %v4971_v2 }
0x1099   : > { %4703 = vmatpush3.bf16.msra.mxu1 %v3525_v45  ;;  %4704 = vmatprep.mubr.msk.bf16.mxu1 %vm4972_vm1, %v4971_v2 }
0x109a   : > { %4716 = vmatprep.subr.bf16.mxu1 %v4971_v2 }
0x10a9   : > { %v3367_v14 = vpop.xlane.xlu0 %3366 }
0x10aa   : > { %4896 = vrcp.f32 %v3367_v14 }
0x10ab   : > { %v3370_v16 = vpop.xlane.xlu1 %3369 }
0x10ac   : > { %4898 = vrcp.f32 %v3370_v16 }
0x10b4   : > { %v4897_v17 = vpop.eup %4896 }
0x10b5   : > { %v3377_v53 = vmul.f32 %v4897_v17, %v5657_v54 }
0x10b6   : > { %v4899_v18 = vpop.eup %4898 }
0x10b7   : > { %v3378_v52 = vmul.f32 %v4899_v18, %v5659_v62  ;;  %v3381_v19 = vpack.c.bf16 %v3377_v53, %v3377_v53 }
0x10b9   : > { %4699 = vmatmul.mubr.msk.bf16.vlgmr.msra.gmra.mrb[44].mxu0 %vm1545_vm5, %v3381_v19  ;;  %v3382_v20 = vpack.c.bf16 %v3378_v52, %v3378_v52 }
0x10ba   : > { %4712 = vmatprep.mubr.msk.bf16.mxu0 %vm4972_vm1, %v4971_v2  ;;  %4709 = vmatpush3.bf16.msra.mxu0 %v4844_v44  ;;  %v4853_v44 = vld [vmem:[%s5896_s14 + $0x68] sm:$0xff]  }
0x10bb   : > { %4705 = vmatmul.mubr.msk.bf16.vlgmr.msra.gmra.mrb[52].mxu1 %vm1545_vm5, %v3382_v20  ;;  %4710 = vmatprep.subr.bf16.mxu0 %v4971_v2  ;;  %v4357_v20 = vld [vmem:[%s5891_s9 + $0x1] ss:$0 sm:$0xff] }
0x10bc   : > { %4720 = vmatprep.mubr.msk.bf16.mxu1 %vm4972_vm1, %v4971_v2 }
0x10be   : > { %4711 = vmatpush3.bf16.msra.mxu0 %v4845_v63 }
0x10bf   : > { %4724 = vmatprep.subr.bf16.mxu0 %v4971_v2 }
0x1169   : > { %v3423_v57 = vpop.f32.mrb[40].mxu0 }
0x116a   : > { %v4688_v21 = vpop.f32.mrb[41].mxu0 }
0x116b   : > { %v3426_v22 = vpop.f32.mrb[42].mxu0  ;;  %v3469_v23 = vpop.f32.mrb[48].mxu1 }
0x116c   : > { %v4689_v54 = vpop.f32.mrb[43].mxu0  ;;  %v4694_v24 = vpop.f32.mrb[49].mxu1 }
0x116d   : > { %v3472_v59 = vpop.f32.mrb[50].mxu1 }
0x116e   : > { %v4695_v62 = vpop.f32.mrb[51].mxu1 }
0x118c   : > { %v3515_v25 = vpop.f32.mrb[44].mxu0 }
0x118d   : > { %v3567_v26 = vcombine.low %v3423_v57, %v3515_v25  ;;  %v3568_v8 = vcombine.high %v3423_v57, %v3515_v25  ;;  %v4700_v27 = vpop.f32.mrb[45].mxu0 }
0x118e   : > { %v3518_v28 = vpop.f32.mrb[46].mxu0  ;;  %v3561_v29 = vpop.f32.mrb[52].mxu1 }
0x118f   : > { %v3583_v30 = vcombine.low %v3469_v23, %v3561_v29  ;;  %v3584_v31 = vcombine.high %v3469_v23, %v3561_v29  ;;  %v4701_v32 = vpop.f32.mrb[47].mxu0  ;;  %v4706_v33 = vpop.f32.mrb[53].mxu1  ;;  %v3575_v35 = vrot.slane %v3567_v26, %v5269_v13  ;;  %v3582_v36 = vrot.slane %v3568_v8, %v5269_v13  ;;  %v4846_v28 = vld [vmem:[%s5894_s12 + $0x10] sm:$0xff]   ;;  %v4847_v29 = vld [vmem:[%s5894_s12 + $0x18] sm:$0xff]  }
0x1190   : > { %v3564_v34 = vpop.f32.mrb[54].mxu1  ;;  %4717 = vmatpush3.bf16.msra.mxu1 %v4846_v28  ;;  %v4048_v28 = vld [vmem:[%s5901_s19] sm:$0x1] }
0x1191   : > { %v3591_v37 = vrot.slane %v3583_v30, %v5269_v13  ;;  %v3598_v38 = vrot.slane %v3584_v31, %v5269_v13  ;;  %v4707_v12 = vpop.f32.mrb[55].mxu1  ;;  %4718 = vmatprep.subr.bf16.mxu1 %v4971_v2  ;;  %v4363_v34 = vld [vmem:[%s5892_s10 + $0x1] ss:$0 sm:$0xff] }
0x1193   : > { %v3599_v0 = vcombine.low %v3575_v35, %v3591_v37  ;;  %v3600_v39 = vcombine.high %v3575_v35, %v3591_v37  ;;  %v3615_v40 = vcombine.low %v3582_v36, %v3598_v38  ;;  %v3616_v43 = vcombine.high %v3582_v36, %v3598_v38  ;;  %v4364_v36 = vld [vmem:[%s5893_s11 + $0x1] ss:$0 sm:$0xff] }
0x1194   : > { %4719 = vmatpush3.bf16.msra.mxu1 %v4847_v29 }
0x1195   : > { %v3607_v4 = vrot.slane %v3599_v0, %v5272_v15  ;;  %v3614_v46 = vrot.slane %v3600_v39, %v5272_v15  ;;  %v3623_v47 = vrot.slane %v3615_v40, %v5272_v15  ;;  %v3630_v48 = vrot.slane %v3616_v43, %v5272_v15  ;;  %4744 = vmatprep.subr.bf16.mxu1 %v4971_v2  ;;  %v4849_v0 = vld [vmem:[%s5896_s14 + $0x48] sm:$0xff]   ;;  %v4850_v39 = vld [vmem:[%s5896_s14 + $0x50] sm:$0xff]   ;;  %v4851_v40 = vld [vmem:[%s5896_s14 + $0x58] sm:$0xff]  }
0x1196   : > { %v4852_v43 = vld [vmem:[%s5896_s14 + $0x60] sm:$0xff]  }
0x1197   : > { %v3635_v49 = vcombine.low %v3607_v4, %v3614_v46  ;;  %v4350_v50 = vcombine.high %v3607_v4, %v3614_v46  ;;  %v3651_v51 = vcombine.low %v3623_v47, %v3630_v48  ;;  %v4351_v55 = vcombine.high %v3623_v47, %v3630_v48  ;;  %v4854_v4 = vld [vmem:[%s5896_s14 + $0x70] sm:$0xff]   ;;  %v4855_v46 = vld [vmem:[%s5896_s14 + $0x78] sm:$0xff]   ;;  %v4370_v47 = vld [vmem:[%s5895_s13 + $0x1] ss:$0 sm:$0xff] }
0x1199   : > { %v3642_v56 = vrot.slane %v3635_v49, %v5269_v13  ;;  %v3650_v58 = vrot.slane %v4350_v50, %v5269_v13  ;;  %v3658_v60 = vrot.slane %v3651_v51, %v5269_v13  ;;  %v3666_v61 = vrot.slane %v4351_v55, %v5269_v13 }
0x119b   : > { %v3668_v3 = vcombine.high %v3642_v56, %v3650_v58  ;;  %v3684_v5 = vcombine.high %v3658_v60, %v3666_v61  ;;  %v3667_v6 = vcombine.low %v3642_v56, %v3650_v58  ;;  %v3683_v7 = vcombine.low %v3658_v60, %v3666_v61 }
0x119d   : > { %v3682_v9 = vrot.slane %v3668_v3, %v5272_v15  ;;  %v3698_v10 = vrot.slane %v3684_v5, %v5272_v15  ;;  %v3675_v42 = vrot.slane %v3667_v6, %v5272_v15  ;;  %v3691_v1 = vrot.slane %v3683_v7, %v5272_v15 }
0x119f   : > { %v3701_v13 = vcombine.low %v3682_v9, %v3698_v10  ;;  %v3700_v11 = vcombine.high %v3675_v42, %v3691_v1  ;;  %v3702_v45 = vcombine.high %v3682_v9, %v3698_v10  ;;  %v3699_v14 = vcombine.low %v3675_v42, %v3691_v1  ;;  %v4391_v10 = vld [vmem:[%s5897_s15 + $0x1] ss:$0 sm:$0xff] }
0x11a1   : > { %3708 = vrot.lane.b32.xlu1 %v3701_v13, %s5941_s26  ;;  %3704 = vrot.lane.b32.xlu0 %v3700_v11, %s5942_s2  ;;  %s5944_s26 = sld [smem:[#allocation18_spill]] }
0x11a5   : > { %3712 = vrot.lane.b32.xlu0 %v3702_v45, %s5943_s1  ;;  %s4168_s1 = scalar_lea.sflag [#allocation3], %s683_s5 }
0x11a7   : > { %s5840_s2 = scalar_lea.hbm %s5944_s26, %s4410_s0 }
0x1213   : > { %v3705_v16 = vpop.permute.xlu0 %3704  ;;  %v3709_v17 = vpop.permute.xlu1 %3708 }
0x1214   : > { %v3715_v53 = vsel %vm1545_vm5, %v3699_v14, %v3705_v16 }
0x1215   : > { %v3716_v52 = vsel %vm2122_vm8, %v3715_v53, %v3709_v17 }
0x1217   : > { %v3713_v18 = vpop.permute.xlu0 %3712 }
0x1218   : > { %v3717_v19 = vsel %vm2124_vm9, %v3716_v52, %v3713_v18 }
0x1219   : > { %v3718_v15 = vpack.c.bf16 %v3717_v19, %v3717_v19 }
0x121b   : > { %4713 = vmatmul.mubr.msk.bf16.vlgmr.msra.gmra.mrb[48].mxu0 %vm810_vm4, %v3718_v15  ;;  %v4856_v15 = vld [vmem:[%s5900_s18] sm:$0xff]  }
0x121c   : > { %4740 = vmatprep.mubr.msk.bf16.mxu0 %vm4972_vm1, %v4971_v2 }
0x12ee   : > { %v3781_v57 = vpop.f32.mrb[48].mxu0 }
0x12ef   : > { %v3782_v21 = vadd.f32 %v4357_v20, %v3781_v57  ;;  %v4714_v22 = vpop.f32.mrb[49].mxu0  ;;  %v4857_v20 = vld [vmem:[%s5900_s18 + $0x8] sm:$0xff]  }
0x12f0   : > { %v3784_v23 = vpop.f32.mrb[50].mxu0 }
0x12f1   : > { %v4715_v54 = vpop.f32.mrb[51].mxu0  ;;  %v3787_v24 = vadd.f32 %v3782_v21, %v5527_v41  ;;  %v4848_v41 = vld [vmem:[%s5896_s14 + $0x40] sm:$0xff]  }
0x12f2   : > { %4725 = vmatpush3.bf16.msra.mxu0 %v4848_v41  ;;  %v4402_v54 = vld [vmem:[%s5898_s16 + $0x1] ss:$0 sm:$0xff] }
0x12f3   : > { %v3792_v59 = vsel %vm810_vm4, %v3787_v24, 0.0  ;;  %4726 = vmatprep.subr.bf16.mxu0 %v4971_v2 }
0x12f4   : > { %3793 = vadd.xlane.f32.xlu1 %v3792_v59  ;;  %v4403_v59 = vld [vmem:[%s5899_s17 + $0x1] ss:$0 sm:$0xff] }
0x12f6   : > { %4727 = vmatpush3.bf16.msra.mxu0 %v4849_v0 }
0x12f7   : > { %4728 = vmatprep.subr.bf16.mxu0 %v4971_v2 }
0x12fa   : > { %4729 = vmatpush3.bf16.msra.mxu0 %v4850_v39 }
0x12fb   : > { %4730 = vmatprep.subr.bf16.mxu0 %v4971_v2 }
0x12fe   : > { %4731 = vmatpush3.bf16.msra.mxu0 %v4851_v40 }
0x12ff   : > { %4732 = vmatprep.subr.bf16.mxu0 %v4971_v2 }
0x1302   : > { %4733 = vmatpush3.bf16.msra.mxu0 %v4852_v43 }
0x1303   : > { %4734 = vmatprep.subr.bf16.mxu0 %v4971_v2 }
0x1306   : > { %4735 = vmatpush3.bf16.msra.mxu0 %v4853_v44 }
0x1307   : > { %4736 = vmatprep.subr.bf16.mxu0 %v4971_v2 }
0x130a   : > { %4737 = vmatpush3.bf16.msra.mxu0 %v4854_v4 }
0x130b   : > { %4738 = vmatprep.subr.bf16.mxu0 %v4971_v2 }
0x130e   : > { %4739 = vmatpush3.bf16.msra.mxu0 %v4855_v46 }
0x1381   : > { %v3794_v62 = vpop.xlane.xlu1 %3793 }
0x1382   : > { %v3795_v25 = vmul.f32 0.03125, %v3794_v62 }
0x1384   : > { %v3796_v26 = vsub.f32 %v3787_v24, %v3795_v25 }
0x1386   : > { %v3797_v8 = vmul.f32 %v3796_v26, %v3796_v26 }
0x1388   : > { %v3798_v27 = vsel %vm810_vm4, %v3797_v8, 0.0  ;;  %v4858_v8 = vld [vmem:[%s5902_s20] sm:$0xff]  }
0x1389   : > { %3799 = vadd.xlane.f32.xlu0 %v3798_v27  ;;  %v4859_v27 = vld [vmem:[%s5902_s20 + $0x8] sm:$0xff]  }
0x1416   : > { %v3800_v30 = vpop.xlane.xlu0 %3799 }
0x1417   : > { %v3801_v31 = vmul.f32 0.03125, %v3800_v30 }
0x1419   : > { %v3802_v32 = vadd.f32 1e-12, %v3801_v31 }
0x141b   : > { %4900 = vrsqrt.f32 %v3802_v32 }
0x1425   : > { %v4901_v33 = vpop.eup %4900 }
0x1426   : > { %v3804_v35 = vmul.f32 %v4901_v33, %v3796_v26 }
0x1428   : > { %v3811_v37 = vmul.f32 %v4363_v34, %v3804_v35 }
0x142a   : > { %v3818_v38 = vadd.f32 %v4364_v36, %v3811_v37 }
0x142c   : > { %v3819_v12 = vpack.c.bf16 %v3818_v38, %v3818_v38 }
0x142e   : > { %4721 = vmatmul.mubr.msk.bf16.vlgmr.msra.gmra.mrb[56].mxu1 %vm810_vm4, %v3819_v12 }
0x142f   : > { %4748 = vmatprep.mubr.msk.bf16.mxu1 %vm4972_vm1, %v4971_v2  ;;  %4745 = vmatpush3.bf16.msra.mxu1 %v4856_v15 }
0x1430   : > { %4746 = vmatprep.subr.bf16.mxu1 %v4971_v2 }
0x1433   : > { %4747 = vmatpush3.bf16.msra.mxu1 %v4857_v20 }
0x1434   : > { %4752 = vmatprep.subr.bf16.mxu1 %v4971_v2 }
0x1501   : > { %v3882_v48 = vpop.f32.mrb[56].mxu1 }
0x1502   : > { %v3883_v49 = vadd.f32 %v4370_v47, %v3882_v48  ;;  %v4722_v50 = vpop.f32.mrb[57].mxu1 }
0x1503   : > { %v3885_v51 = vpop.f32.mrb[58].mxu1 }
0x1504   : > { %v3889_v55 = vmul.f32 0.044715, %v3883_v49  ;;  %v4723_v56 = vpop.f32.mrb[59].mxu1  ;;  %v3888_v5 = vmul.f32 0.5, %v3883_v49 }
0x1506   : > { %v3890_v58 = vmul.f32 %v3889_v55, %v3883_v49 }
0x1508   : > { %v3891_v60 = vmul.f32 %v3890_v58, %v3883_v49 }
0x150a   : > { %v3892_v61 = vadd.f32 %v3891_v60, %v3883_v49 }
0x150c   : > { %v3893_v63 = vmul.f32 0.7978846, %v3892_v61 }
0x150e   : > { %4902 = vtanh.f32 %v3893_v63 }
0x1518   : > { %v4903_v3 = vpop.eup %4902 }
0x1519   : > { %v3895_v6 = vadd.f32 1.0, %v4903_v3 }
0x151b   : > { %v3896_v7 = vmul.f32 %v3895_v6, %v3888_v5 }
0x151d   : > { %v3897_v9 = vpack.c.bf16 %v3896_v7, %v3896_v7 }
0x151f   : > { %4741 = vmatmul.mubr.bf16.vlgmr.msra.gmra.mrb[52].mxu0 %v3897_v9 }
0x15f2   : > { %v4005_v42 = vpop.f32.mrb[52].mxu0 }
0x15f3   : > { %v4006_v1 = vadd.f32 %v4391_v10, %v4005_v42  ;;  %v4742_v13 = vpop.f32.mrb[53].mxu0 }
0x15f4   : > { %v4008_v11 = vpop.f32.mrb[54].mxu0 }
0x15f5   : > { %v4743_v45 = vpop.f32.mrb[55].mxu0  ;;  %v4011_v14 = vadd.f32 %v4006_v1, %v3818_v38 }
0x15f7   : > { %v4016_v16 = vsel %vm810_vm4, %v4011_v14, 0.0 }
0x15f8   : > { %4017 = vadd.xlane.f32.xlu0 %v4016_v16 }
0x1685   : > { %v4018_v17 = vpop.xlane.xlu0 %4017 }
0x1686   : > { %v4019_v53 = vmul.f32 0.03125, %v4018_v17 }
0x1688   : > { %v4020_v18 = vsub.f32 %v4011_v14, %v4019_v53 }
0x168a   : > { %v4021_v52 = vmul.f32 %v4020_v18, %v4020_v18 }
0x168c   : > { %v4022_v19 = vsel %vm810_vm4, %v4021_v52, 0.0 }
0x168d   : > { %4023 = vadd.xlane.f32.xlu1 %v4022_v19 }
0x171a   : > { %v4024_v57 = vpop.xlane.xlu1 %4023 }
0x171b   : > { %v4025_v21 = vmul.f32 0.03125, %v4024_v57 }
0x171d   : > { %v4026_v22 = vadd.f32 1e-12, %v4025_v21 }
0x171f   : > { %4904 = vrsqrt.f32 %v4026_v22 }
0x1729   : > { %v4905_v23 = vpop.eup %4904 }
0x172a   : > { %v4028_v24 = vmul.f32 %v4905_v23, %v4020_v18 }
0x172c   : > { %v4035_v62 = vmul.f32 %v4402_v54, %v4028_v24 }
0x172e   : > { %v4042_v25 = vadd.f32 %v4403_v59, %v4035_v62 }
0x1730   : > { %v4043_v26 = vpack.c.bf16 %v4042_v25, %v4042_v25 }
0x1732   : > { %4749 = vmatmul.mubr.msk.bf16.vlgmr.msra.gmra.mrb[60].mxu1 %vm810_vm4, %v4043_v26 }
0x1733   : > { %4756 = vmatprep.mubr.msk.bf16.mxu1 %vm4972_vm1, %v4971_v2  ;;  %4753 = vmatpush3.bf16.msra.mxu1 %v4858_v8 }
0x1734   : > { %4754 = vmatprep.subr.bf16.mxu1 %v4971_v2  ;;  %v4110_v2 = vld [vmem:[%s5903_s21] sm:$0x1] }
0x1737   : > { %4755 = vmatpush3.bf16.msra.mxu1 %v4859_v27 }
0x1805   : > { %v4098_v29 = vpop.f32.mrb[60].mxu1 }
0x1806   : > { %v4099_v41 = vadd.f32 %v4098_v29, %v4048_v28  ;;  %v4750_v30 = vpop.f32.mrb[61].mxu1 }
0x1807   : > { %v4101_v31 = vpop.f32.mrb[62].mxu1 }
0x1808   : > { %v4104_v32 = vmax.f32 %v4099_v41, 0.0  ;;  %v4751_v33 = vpop.f32.mrb[63].mxu1 }
0x180a   : > { %v4105_v34 = vpack.c.bf16 %v4104_v32, %v4104_v32 }
0x180c   : > { %4757 = vmatmul.mubr.msk.bf16.vlgmr.msra.gmra.mrb[64].mxu1 %vm810_vm4, %v4105_v34 }
0x18df   : > { %v4160_v35 = vpop.f32.mrb[64].mxu1 }
0x18e0   : > { %v4161_v36 = vadd.f32 %v4160_v35, %v4110_v2  ;;  %v4758_v37 = vpop.f32.mrb[65].mxu1 }
0x18e1   : > { %v4163_v38 = vpop.f32.mrb[66].mxu1 }
0x18e2   : > { %4166 = vst [vmem:[%s684_s3] sm:$0x1] %v4161_v36  ;;  %v4759_v12 = vpop.f32.mrb[67].mxu1 }
0x18e3   : > { %4919 = shalt.err (!%p4916_p3)
}
0x18e4   : > { %s4920_s5 = scalar_lea.hbm %s5840_s2, 16  ;;  %s4924_s25 = scalar_lea.hbm %s5944_s26, 32 }
0x18e5   : > { %p4921_p4 = scmp.ne.s32.totalorder %s5840_s2, %s4920_s5  ;;  %p4925_p9 = scmp.lt.u32.totalorder %s5840_s2, %s5944_s26 }
0x18e6   : > { %p4926_p10 = scmp.lt.u32.totalorder %s4924_s25, %s4920_s5  ;;  %p4928_p12 = scmp.lt.u32.totalorder %s4920_s5, %s5840_s2 }
0x18e7   : > { %p4922_p7 = pnand %p4921_p4, %p5136_p5 }
0x18e8   : > { %p4927_p11 = por %p4926_p10, %p4925_p9 }
0x18e9   : > { %p4923_p8 = pneg %p4922_p7 }
0x18ea   : > { %p4929_p13 = por %p4928_p12, %p4927_p11 }
0x18ec   : > { %p4930_p0 = pnand %p4929_p13, %p4923_p8 }
0x18ee   : > { %4933 = shalt.err (!%p4930_p0)
}
0x18ef   : > { %4760 = dma.vmem_to_hbm [thread:$0]  (%p5136_p5), %s5842_s30, 16, %s5840_s2, %s4168_s1  }
0x18f0 PF: > { %s5945_s4 = sld [smem:[#allocation7_spill]]  ;;  %s5946_s24 = sld [smem:[#allocation5_spill]] }
0x18f6   : > { %p4766_p1 = scmp.ge.s32.totalorder %s5945_s4, 2  ;;  %s4192_s3 = sand.u32 1, %s5946_s24  }
0x18f7   : > { %s4193_s29 = scalar_lea.sflag [#allocation3], %s4192_s3 }
0x18f8   : > { %p4763_p2 = pnand %p4766_p1, %p5140_p6 }
0x18fa   : > { %4951 = dma.done.wait (!%p4763_p2), %s4193_s29, 16  }
0x18fb   : > { %4953 = vsyncadd (!%p4763_p2), %s4193_s29, 4294967280  ;;  %s5948_s30 = sld [smem:[#allocation8_spill]]  ;;  %s5949_s5 = sld [smem:[#allocation6_spill]] }
0x18fc   : > { %s5950_s29 = sld [smem:[#allocation9_spill]]  ;;  %s5951_s3 = smov %s4960_s28 }
0x1901   : > { %p32_p3 = scmp.ge.s32.totalorder %s5948_s30, 4   ;;  %s5952_s28 = smov %s5949_s5 }
0x1903   :  { %34 = sbr.rel (!%p32_p3) target bundleno = 12 (0xc), region = 166 }
0x190a   :  { %4197 = vsyncpa [#allocation3], 1 }
0x190b   :  { %4199 = vsyncpa [#allocation3 + $0x1], 1 }

</bundles_post_ra>
